<compile_context>
chip_gen: v6e
topology: v6e:2x2x1
jax: 0.10.0
libtpu: 0.0.40
codegen_flags: <defaults>
</compile_context>

<pallas_src>
import math

import jax
import jax.numpy as jnp
from jax import lax
from jax.experimental import pallas as pl
from jax.experimental.pallas import tpu as pltpu

INV_TWO_SIGMA2 = 50.0   # renderer stand-in falloff (sigma = 0.1 in normalized BEV coords)


# ----------------------------- fused Pallas kernel -----------------------------

def _fused_encoder_kernel(bcat_ref, feat0_ref, op0_ref, wgeo_ref, wcat_ref,
                          w2_ref, b2_ref, bev_ref, delta_ref, feat_s, op_s):
    """One grid step = one (batch, iteration) pair.

    feat_s / op_s are persistent VMEM scratch carrying the gaussian feature matrix and the
    opacity logits across iterations of the same batch (re-initialized at t == 0).
    """
    C = feat0_ref.shape[1]                       # embed dims (Wf half of the fused weight)
    n_pad, op_lanes = delta_ref.shape[2], delta_ref.shape[3]

    bcat = bcat_ref[0]                           # (1, C + H1) f32: [pooled@Wi + bf | b1]

    # ---- t == 0: software-pipeline peel — compute iteration-0's new feat from the initial
    #      (zero) gaussians_feat, and load the initial opacity logits.
    @pl.when(pl.program_id(1) == 0)
    def _():
        fused0 = jnp.maximum(
            jnp.dot(feat0_ref[...], wcat_ref[...],
                    preferred_element_type=jnp.float32) + bcat, 0.0)
        feat_s[...] = fused0[:, :C]              # relu(feat0 @ Wf + bias)
        op_s[...] = op0_ref[...]

    feat = feat_s[...]                           # (n_pad, C) f32 — this iteration's feat
    op = op_s[...]                               # (n_pad, 1)  f32 — this iteration's opacity

    # ---- gaussians_renderer stand-in: bev = exp(-d2/2s^2) @ (feat * sigmoid(opacity))
    #      (padded columns of w_geo are exactly 0, so padded feat rows never leak)
    fr = (feat * jax.nn.sigmoid(op)).astype(jnp.bfloat16)
    bev_ref[0, 0] = jnp.dot(wgeo_ref[...], fr,
                            preferred_element_type=jnp.float32).astype(bev_ref.dtype)

    # ---- fused gaussian_layer projection + gaussian_head hidden layer:
    #      one N=384 MXU pass; lanes [0:C] = next iteration's feat, [C:] = head hidden.
    fused = jnp.maximum(
        jnp.dot(feat.astype(jnp.bfloat16), wcat_ref[...],
                preferred_element_type=jnp.float32) + bcat, 0.0)
    feat_s[...] = fused[:, :C]                   # carry to next grid step (unused after last t)

    h = fused[:, C:].astype(jnp.bfloat16)        # (n_pad, H1) head hidden
    delta = jnp.dot(h, w2_ref[...], preferred_element_type=jnp.float32) + b2_ref[...]
    delta_ref[0, 0] = delta                      # all rows, 128 lanes -> unmasked stores

    # refine_gaussians: xyz frozen; next opacity logit = delta column 7 (lane select + reduce)
    lane = lax.broadcasted_iota(jnp.int32, (n_pad, op_lanes), 1)
    op_s[...] = jnp.sum(jnp.where(lane == 7, delta, 0.0), axis=1, keepdims=True)


def fused_gaussian_encoder(bcat_b, feat0_pad, op0_col, w_geo, wcat, w2p, b2p,
                           *, num_iterations, bev_dtype=jnp.bfloat16):
    B = bcat_b.shape[0]
    n_pad, C = feat0_pad.shape
    Ccat = wcat.shape[1]
    H1 = w2p.shape[0]
    OP = w2p.shape[1]
    HW = w_geo.shape[0]
    T = num_iterations

    def _bytes(shape, dt):
        return math.prod(shape) * jnp.dtype(dt).itemsize

    # Explicit per-step VMEM budget: double-buffered inputs + outputs, persistent scratch,
    # with lane padding accounted for and 2x headroom.
    budget = (
        2 * (_bytes((1, Ccat), jnp.float32)
             + _bytes((n_pad, C), jnp.bfloat16)
             + _bytes((n_pad, 128), jnp.float32)                 # op0 (lane-padded)
             + _bytes((HW, max(n_pad, 128)), jnp.bfloat16)        # w_geo
             + _bytes((C, Ccat), jnp.bfloat16)
             + _bytes((H1, OP), jnp.bfloat16)
             + _bytes((8, OP), jnp.float32)
             + _bytes((HW, C), bev_dtype)
             + _bytes((n_pad, OP), jnp.float32))
        + _bytes((n_pad, C), jnp.float32) + _bytes((n_pad, 128), jnp.float32))
    vmem_limit = int(min(max(2 * budget + (4 << 20), 32 << 20), 120 << 20))

    return pl.pallas_call(
        _fused_encoder_kernel,
        out_shape=(
            jax.ShapeDtypeStruct((B, T, HW, C), bev_dtype),        # bev per iteration (bf16)
            jax.ShapeDtypeStruct((B, T, n_pad, OP), jnp.float32),  # head delta (lane-padded)
        ),
        grid=(B, T),
        in_specs=[
            pl.BlockSpec((1, 1, Ccat), lambda b, t: (b, 0, 0)),    # per-batch fused bias
            pl.BlockSpec((n_pad, C), lambda b, t: (0, 0)),         # initial gaussians_feat
            pl.BlockSpec((n_pad, 1), lambda b, t: (0, 0)),         # initial opacity logits
            pl.BlockSpec((HW, n_pad), lambda b, t: (0, 0)),        # geometric splat weights
            pl.BlockSpec((C, Ccat), lambda b, t: (0, 0)),          # [Wf | W1] bf16
            pl.BlockSpec((H1, OP), lambda b, t: (0, 0)),           # W2 (lane-padded) bf16
            pl.BlockSpec((1, OP), lambda b, t: (0, 0)),            # b2 (lane-padded)
        ],
        out_specs=(
            pl.BlockSpec((1, 1, HW, C), lambda b, t: (b, t, 0, 0)),
            pl.BlockSpec((1, 1, n_pad, OP), lambda b, t: (b, t, 0, 0)),
        ),
        scratch_shapes=[
            pltpu.VMEM((n_pad, C), jnp.float32),   # gaussians_feat carry
            pltpu.VMEM((n_pad, 1), jnp.float32),   # opacity logit carry
        ],
        compiler_params=pltpu.CompilerParams(
            dimension_semantics=("parallel", "arbitrary"),
            vmem_limit_bytes=vmem_limit),
    )(bcat_b, feat0_pad, op0_col, w_geo, wcat, w2p, b2p)


# ----------------------------- module glue (plain JAX) -------------------------

def inverse_sigmoid(x, eps=1e-5):
    x = jnp.clip(x, 0.0, 1.0)
    x1 = jnp.clip(x, eps, None)
    x2 = jnp.clip(1.0 - x, eps, None)
    return jnp.log(x1 / x2)


def init_gaussians(bev_h, bev_w, z, gaussian_h, gaussian_w, embed_dims):
    offset = (bev_h // gaussian_h) / 2
    xs = jnp.linspace(offset, bev_w - offset, gaussian_w)[::-1]
    xs = jnp.broadcast_to(xs.reshape(1, gaussian_w), (gaussian_h, gaussian_w)) / bev_w
    ys = jnp.linspace(offset, bev_h - offset, gaussian_h)[::-1]
    ys = jnp.broadcast_to(ys.reshape(gaussian_h, 1), (gaussian_h, gaussian_w)) / bev_h
    xyz = jnp.stack((ys, xs), -1)
    xyz = jnp.concatenate(
        [xyz, jnp.zeros((gaussian_h, gaussian_w, 1)) + 0.5], axis=-1
    ).reshape(gaussian_h * gaussian_w, 3)
    scale = inverse_sigmoid(jnp.ones_like(xyz))
    rots = jnp.zeros((gaussian_h * gaussian_w, 4)).at[:, 0].set(1.0)
    opacity = inverse_sigmoid(0.1 * jnp.ones((gaussian_h * gaussian_w, 1)))
    gaussians = jnp.concatenate([xyz, scale, rots, opacity], axis=1).astype(jnp.float32)
    gaussians_feat = jnp.zeros((gaussian_h * gaussian_w, embed_dims), jnp.float32)
    return gaussians, gaussians_feat


def gaussian_encoder_forward(mlvl_feats, lidar2img, params, num_iterations, bev_h, bev_w):
    b = lidar2img.shape[0]
    G = 1
    feats = []
    for feat in mlvl_feats:
        b_, n, gc, h, w = feat.shape
        c = gc // G
        # rearrange 'b n (g c) h w -> (b g) n h w c'
        feat = feat.reshape(b_, n, G, c, h, w).transpose(0, 2, 1, 4, 5, 3)
        feats.append(feat.reshape(b_ * G, n, h, w, c))

    gaussians0 = params["gaussians"]          # (N, 11): col0=y, col1=x, col10=opacity logit
    gfeat0 = params["gaussians_feat"]         # (N, C)
    N, C = gfeat0.shape
    H1 = params["w1"].shape[1]
    OP = 128                                  # head output lanes padded to 128 (lane-dense)
    n_pad = max(16, pl.cdiv(N, 16) * 16)      # bf16-sublane-friendly row count (no forced 128)
    HW = bev_h * bev_w
    T = num_iterations

    # TODO(synk): the real `gaussian_layer` is an injected deformable-sampling module with no
    # source; this stand-in pools the image and projects it — hoisted (loop-invariant) into a
    # per-batch bias and concatenated with the head bias b1.
    pooled = jnp.mean(feats[0], axis=(1, 2, 3))                          # (b, Cimg)
    bias_b = pooled @ params["wi"] + params["bf"]                        # (b, C)
    bcat_b = jnp.concatenate(
        [bias_b, jnp.broadcast_to(params["b1"], (b, H1))], axis=-1)[:, None, :]  # (b,1,C+H1)

    # Weights pre-cast to bf16 once in glue (fused [Wf | W1] and lane-padded W2).
    wcat = jnp.concatenate([params["wf"], params["w1"]], axis=1).astype(jnp.bfloat16)
    w2p = jnp.zeros((H1, OP), jnp.float32).at[:, :8].set(params["w2"]).astype(jnp.bfloat16)
    b2p = jnp.zeros((1, OP), jnp.float32).at[:, :8].set(params["b2"])

    # Batch- and iteration-invariant geometric splat weights (gaussians_renderer stand-in).
    # Integer row/col derivation (exact), padded columns explicitly zeroed so padded feat rows
    # can never leak into the BEV output.
    ii = jnp.arange(HW, dtype=jnp.int32)
    gy = ((ii // bev_w).astype(jnp.float32) + 0.5) / bev_h
    gx = ((ii % bev_w).astype(jnp.float32) + 0.5) / bev_w
    ys = gaussians0[:, 0]
    xs = gaussians0[:, 1]
    d2 = (gx[:, None] - xs[None, :]) ** 2 + (gy[:, None] - ys[None, :]) ** 2     # (HW, N)
    w_geo = jnp.zeros((HW, n_pad), jnp.float32).at[:, :N].set(
        jnp.exp(-d2 * INV_TWO_SIGMA2)).astype(jnp.bfloat16)

    op0_col = jnp.zeros((n_pad, 1), jnp.float32).at[:N, 0].set(gaussians0[:, 10])
    feat0_pad = jnp.zeros((n_pad, C), jnp.bfloat16).at[:N].set(gfeat0.astype(jnp.bfloat16))

    bev_all, delta_all = fused_gaussian_encoder(
        bcat_b, feat0_pad, op0_col, w_geo, wcat, w2p, b2p, num_iterations=T)

    # TODO(synk): sampled points (gaussian_layer stand-in) project the frozen xyz with
    # lidar2img, hence loop-invariant -> computed once.
    xyz = jnp.broadcast_to(gaussians0[None, :, :3], (b, N, 3))
    pts_h = jnp.concatenate([xyz, jnp.ones((b, N, 1), xyz.dtype)], axis=-1)
    sampled = jnp.einsum("bnij,bgj->bngi", lidar2img, pts_h)[..., :3]    # (b, n_cam, N, 3)

    gaussians = jnp.broadcast_to(gaussians0[None], (b,) + gaussians0.shape)
    delta_real = delta_all[:, :, :N, :8]                                 # drop row/lane padding
    out_bev_feats, out_sampled_points, out_gaussians = [], [], [gaussians]
    for t in range(T):
        # BEV kept channel-last (b, H, W, C) in bf16; transpose/cast once downstream if needed.
        out_bev_feats.append(bev_all[:, t].reshape(b, bev_h, bev_w, C))
        out_sampled_points.append(sampled)
        # refine_gaussians: keep xyz, replace remaining 8 dims with the head delta
        out_gaussians.append(
            jnp.concatenate([gaussians[..., 0:3], delta_real[:, t]], axis=-1))
    return out_bev_feats, out_sampled_points, out_gaussians


# ----------------------------- main --------------------------------------------

if __name__ == "__main__":
    key = jax.random.PRNGKey(0)
    k1, k2, k3, k4, k5, k6 = jax.random.split(key, 6)

    # small shapes
    b, n_cam, c_img, hf, wfm = 2, 2, 32, 8, 8
    bev_h = bev_w = 16
    gaussian_h = gaussian_w = 8          # N = 64 gaussians
    embed_dims = 128                     # gaussian_head is MLP(128, 256, 8)
    num_iterations = 2

    feat = jax.random.normal(k1, (b, n_cam, c_img, hf, wfm), jnp.float32)
    lidar2img = jax.random.normal(k2, (b, n_cam, 4, 4), jnp.float32)

    gaussians0, gaussians_feat0 = init_gaussians(
        bev_h, bev_w, 1, gaussian_h, gaussian_w, embed_dims)

    params = {
        "gaussians": gaussians0,
        "gaussians_feat": gaussians_feat0,
        # gaussian_head MLP(128, 256, 8)
        "w1": 0.02 * jax.random.normal(k3, (embed_dims, 256), jnp.float32),
        "b1": jnp.zeros((1, 256), jnp.float32),
        "w2": 0.02 * jax.random.normal(k4, (256, 8), jnp.float32),
        "b2": jnp.zeros((1, 8), jnp.float32),
        # gaussian_layer stand-in projections
        "wf": 0.02 * jax.random.normal(k5, (embed_dims, embed_dims), jnp.float32),
        "wi": 0.02 * jax.random.normal(k6, (c_img, embed_dims), jnp.float32),
        "bf": jnp.zeros((1, embed_dims), jnp.float32),
    }

    outs = gaussian_encoder_forward([feat], lidar2img, params, num_iterations, bev_h, bev_w)
    jax.block_until_ready(outs)
    print("KERNEL_OK")
</pallas_src>

<mosaic_0001>
module attributes {stable_mosaic.version = 11 : i64} {
  func.func @_fused_encoder_kernel(%arg0: i32, %arg1: i32, %arg2: memref<1x1x384xf32, #tpu.memory_space<vmem>>, %arg3: memref<64x128xbf16, #tpu.memory_space<vmem>>, %arg4: memref<64x1xf32, #tpu.memory_space<vmem>>, %arg5: memref<256x64xbf16, #tpu.memory_space<vmem>>, %arg6: memref<128x384xbf16, #tpu.memory_space<vmem>>, %arg7: memref<256x128xbf16, #tpu.memory_space<vmem>>, %arg8: memref<1x128xf32, #tpu.memory_space<vmem>>, %arg9: memref<1x1x256x128xbf16, #tpu.memory_space<vmem>>, %arg10: memref<1x1x64x128xf32, #tpu.memory_space<vmem>>, %arg11: memref<64x128xf32, #tpu.memory_space<vmem>>, %arg12: memref<64x1xf32, #tpu.memory_space<vmem>>) attributes {dimension_semantics = [#tpu.dimension_semantics<parallel>, #tpu.dimension_semantics<arbitrary>], iteration_bounds = array<i64: 2, 2>, scalar_prefetch = 0 : i64, scratch_operands = 2 : i64, tpu.core_type = #tpu.core_type<tc>, window_params = [{transform_indices = @transform_0, window_bounds = array<i64: 1, 1, 384>}, {pipeline_mode = #tpu.pipeline_mode<synchronous>, transform_indices = @transform_1, window_bounds = array<i64: 64, 128>}, {pipeline_mode = #tpu.pipeline_mode<synchronous>, transform_indices = @transform_2, window_bounds = array<i64: 64, 1>}, {pipeline_mode = #tpu.pipeline_mode<synchronous>, transform_indices = @transform_3, window_bounds = array<i64: 256, 64>}, {pipeline_mode = #tpu.pipeline_mode<synchronous>, transform_indices = @transform_4, window_bounds = array<i64: 128, 384>}, {pipeline_mode = #tpu.pipeline_mode<synchronous>, transform_indices = @transform_5, window_bounds = array<i64: 256, 128>}, {pipeline_mode = #tpu.pipeline_mode<synchronous>, transform_indices = @transform_6, window_bounds = array<i64: 1, 128>}, {transform_indices = @transform_7, window_bounds = array<i64: 1, 1, 256, 128>}, {transform_indices = @transform_8, window_bounds = array<i64: 1, 1, 64, 128>}]} {
    %c0 = arith.constant 0 : index
    %c0_0 = arith.constant 0 : index
    %c0_1 = arith.constant 0 : index
    %0 = vector.load %arg2[%c0, %c0_0, %c0_1] : memref<1x1x384xf32, #tpu.memory_space<vmem>>, vector<1x1x384xf32>
    %1 = vector.shape_cast %0 : vector<1x1x384xf32> to vector<1x384xf32>
    %c0_i32 = arith.constant 0 : i32
    %2 = arith.cmpi eq, %arg1, %c0_i32 : i32
    %3 = arith.extui %2 : i1 to i32
    %c0_i32_2 = arith.constant 0 : i32
    %4 = arith.cmpi ne, %3, %c0_i32_2 : i32
    scf.if %4 {
      %c0_33 = arith.constant 0 : index
      %c0_34 = arith.constant 0 : index
      %48 = vector.load %arg3[%c0_33, %c0_34] : memref<64x128xbf16, #tpu.memory_space<vmem>>, vector<64x128xbf16>
      %c0_35 = arith.constant 0 : index
      %c0_36 = arith.constant 0 : index
      %49 = vector.load %arg6[%c0_35, %c0_36] : memref<128x384xbf16, #tpu.memory_space<vmem>>, vector<128x384xbf16>
      %cst_37 = arith.constant dense<0.000000e+00> : vector<64x384xf32>
      %50 = tpu.matmul %48, %49, %cst_37 {dimension_numbers = #tpu.dot_dimension_numbers<[1], [0], [0], [1], [0, 0, 1, 1], [], []>} : vector<64x128xbf16>, vector<128x384xbf16>, vector<64x384xf32> -> vector<64x384xf32>
      %51 = vector.broadcast %1 : vector<1x384xf32> to vector<64x384xf32>
      %52 = arith.addf %50, %51 : vector<64x384xf32>
      %cst_38 = arith.constant 0.000000e+00 : f32
      %53 = vector.broadcast %cst_38 : f32 to vector<64x384xf32>
      %54 = arith.maximumf %52, %53 : vector<64x384xf32>
      %55 = vector.extract_strided_slice %54 {offsets = [0, 0], sizes = [64, 128], strides = [1, 1]} : vector<64x384xf32> to vector<64x128xf32>
      %c0_39 = arith.constant 0 : index
      %c0_40 = arith.constant 0 : index
      %56 = vector.load %arg11[%c0_39, %c0_40] : memref<64x128xf32, #tpu.memory_space<vmem>>, vector<64x128xf32>
      tpu.vector_store %arg11[%c0_39, %c0_40], %55 {strides = array<i32>} : memref<64x128xf32, #tpu.memory_space<vmem>>, vector<64x128xf32>,
      %c0_41 = arith.constant 0 : index
      %c0_42 = arith.constant 0 : index
      %57 = vector.load %arg4[%c0_41, %c0_42] : memref<64x1xf32, #tpu.memory_space<vmem>>, vector<64x1xf32>
      %c0_43 = arith.constant 0 : index
      %c0_44 = arith.constant 0 : index
      %58 = vector.load %arg12[%c0_43, %c0_44] : memref<64x1xf32, #tpu.memory_space<vmem>>, vector<64x1xf32>
      tpu.vector_store %arg12[%c0_43, %c0_44], %57 {strides = array<i32>} : memref<64x1xf32, #tpu.memory_space<vmem>>, vector<64x1xf32>,
    } else {
    }
    %c0_3 = arith.constant 0 : index
    %c0_4 = arith.constant 0 : index
    %5 = vector.load %arg11[%c0_3, %c0_4] : memref<64x128xf32, #tpu.memory_space<vmem>>, vector<64x128xf32>
    %c0_5 = arith.constant 0 : index
    %c0_6 = arith.constant 0 : index
    %6 = vector.load %arg12[%c0_5, %c0_6] : memref<64x1xf32, #tpu.memory_space<vmem>>, vector<64x1xf32>
    %7 = arith.negf %6 : vector<64x1xf32>
    %8 = math.exp %7 : vector<64x1xf32>
    %cst = arith.constant 1.000000e+00 : f32
    %9 = vector.broadcast %cst : f32 to vector<64x1xf32>
    %10 = arith.addf %9, %8 : vector<64x1xf32>
    %11 = arith.divf %9, %10 : vector<64x1xf32>
    %12 = vector.broadcast %11 : vector<64x1xf32> to vector<64x128xf32>
    %13 = arith.mulf %5, %12 : vector<64x128xf32>
    %14 = arith.truncf %13 : vector<64x128xf32> to vector<64x128xbf16>
    %c0_7 = arith.constant 0 : index
    %c0_8 = arith.constant 0 : index
    %15 = vector.load %arg5[%c0_7, %c0_8] : memref<256x64xbf16, #tpu.memory_space<vmem>>, vector<256x64xbf16>
    %cst_9 = arith.constant dense<0.000000e+00> : vector<256x128xf32>
    %16 = tpu.matmul %15, %14, %cst_9 {dimension_numbers = #tpu.dot_dimension_numbers<[1], [0], [0], [1], [0, 0, 1, 1], [], []>} : vector<256x64xbf16>, vector<64x128xbf16>, vector<256x128xf32> -> vector<256x128xf32>
    %17 = arith.truncf %16 : vector<256x128xf32> to vector<256x128xbf16>
    %c0_10 = arith.constant 0 : index
    %c0_11 = arith.constant 0 : index
    %c0_12 = arith.constant 0 : index
    %c0_13 = arith.constant 0 : index
    %18 = vector.load %arg9[%c0_10, %c0_11, %c0_12, %c0_13] : memref<1x1x256x128xbf16, #tpu.memory_space<vmem>>, vector<1x1x256x128xbf16>
    %19 = vector.shape_cast %18 : vector<1x1x256x128xbf16> to vector<256x128xbf16>
    %20 = vector.shape_cast %17 : vector<256x128xbf16> to vector<1x1x256x128xbf16>
    tpu.vector_store %arg9[%c0_10, %c0_11, %c0_12, %c0_13], %20 {strides = array<i32>} : memref<1x1x256x128xbf16, #tpu.memory_space<vmem>>, vector<1x1x256x128xbf16>,
    %21 = arith.truncf %5 : vector<64x128xf32> to vector<64x128xbf16>
    %c0_14 = arith.constant 0 : index
    %c0_15 = arith.constant 0 : index
    %22 = vector.load %arg6[%c0_14, %c0_15] : memref<128x384xbf16, #tpu.memory_space<vmem>>, vector<128x384xbf16>
    %cst_16 = arith.constant dense<0.000000e+00> : vector<64x384xf32>
    %23 = tpu.matmul %21, %22, %cst_16 {dimension_numbers = #tpu.dot_dimension_numbers<[1], [0], [0], [1], [0, 0, 1, 1], [], []>} : vector<64x128xbf16>, vector<128x384xbf16>, vector<64x384xf32> -> vector<64x384xf32>
    %24 = vector.broadcast %1 : vector<1x384xf32> to vector<64x384xf32>
    %25 = arith.addf %23, %24 : vector<64x384xf32>
    %cst_17 = arith.constant 0.000000e+00 : f32
    %26 = vector.broadcast %cst_17 : f32 to vector<64x384xf32>
    %27 = arith.maximumf %25, %26 : vector<64x384xf32>
    %28 = vector.extract_strided_slice %27 {offsets = [0, 0], sizes = [64, 128], strides = [1, 1]} : vector<64x384xf32> to vector<64x128xf32>
    %c0_18 = arith.constant 0 : index
    %c0_19 = arith.constant 0 : index
    %29 = vector.load %arg11[%c0_18, %c0_19] : memref<64x128xf32, #tpu.memory_space<vmem>>, vector<64x128xf32>
    tpu.vector_store %arg11[%c0_18, %c0_19], %28 {strides = array<i32>} : memref<64x128xf32, #tpu.memory_space<vmem>>, vector<64x128xf32>,
    %30 = vector.extract_strided_slice %27 {offsets = [0, 128], sizes = [64, 256], strides = [1, 1]} : vector<64x384xf32> to vector<64x256xf32>
    %31 = arith.truncf %30 : vector<64x256xf32> to vector<64x256xbf16>
    %c0_20 = arith.constant 0 : index
    %c0_21 = arith.constant 0 : index
    %32 = vector.load %arg7[%c0_20, %c0_21] : memref<256x128xbf16, #tpu.memory_space<vmem>>, vector<256x128xbf16>
    %cst_22 = arith.constant dense<0.000000e+00> : vector<64x128xf32>
    %33 = tpu.matmul %31, %32, %cst_22 {dimension_numbers = #tpu.dot_dimension_numbers<[1], [0], [0], [1], [0, 0, 1, 1], [], []>} : vector<64x256xbf16>, vector<256x128xbf16>, vector<64x128xf32> -> vector<64x128xf32>
    %c0_23 = arith.constant 0 : index
    %c0_24 = arith.constant 0 : index
    %34 = vector.load %arg8[%c0_23, %c0_24] : memref<1x128xf32, #tpu.memory_space<vmem>>, vector<1x128xf32>
    %35 = vector.broadcast %34 : vector<1x128xf32> to vector<64x128xf32>
    %36 = arith.addf %33, %35 : vector<64x128xf32>
    %c0_25 = arith.constant 0 : index
    %c0_26 = arith.constant 0 : index
    %c0_27 = arith.constant 0 : index
    %c0_28 = arith.constant 0 : index
    %37 = vector.load %arg10[%c0_25, %c0_26, %c0_27, %c0_28] : memref<1x1x64x128xf32, #tpu.memory_space<vmem>>, vector<1x1x64x128xf32>
    %38 = vector.shape_cast %37 : vector<1x1x64x128xf32> to vector<64x128xf32>
    %39 = vector.shape_cast %36 : vector<64x128xf32> to vector<1x1x64x128xf32>
    tpu.vector_store %arg10[%c0_25, %c0_26, %c0_27, %c0_28], %39 {strides = array<i32>} : memref<1x1x64x128xf32, #tpu.memory_space<vmem>>, vector<1x1x64x128xf32>,
    %40 = tpu.iota {dimensions = array<i32: 1>} : vector<64x128xi32>
    %c7_i32 = arith.constant 7 : i32
    %41 = vector.broadcast %c7_i32 : i32 to vector<64x128xi32>
    %42 = arith.cmpi eq, %40, %41 : vector<64x128xi32>
    %cst_29 = arith.constant 0.000000e+00 : f32
    %43 = vector.broadcast %cst_29 : f32 to vector<64x128xf32>
    %44 = arith.select %42, %36, %43 : vector<64x128xi1>, vector<64x128xf32>
    %cst_30 = arith.constant dense<0.000000e+00> : vector<64xf32>
    %45 = vector.multi_reduction <add>, %44, %cst_30 [1] : vector<64x128xf32> to vector<64xf32>
    %46 = vector.shape_cast %45 : vector<64xf32> to vector<64x1xf32>
    %c0_31 = arith.constant 0 : index
    %c0_32 = arith.constant 0 : index
    %47 = vector.load %arg12[%c0_31, %c0_32] : memref<64x1xf32, #tpu.memory_space<vmem>>, vector<64x1xf32>
    tpu.vector_store %arg12[%c0_31, %c0_32], %46 {strides = array<i32>} : memref<64x1xf32, #tpu.memory_space<vmem>>, vector<64x1xf32>,
    return
  }
  func.func @transform_0(%arg0: i32, %arg1: i32) -> (i32, i32, i32) {
    %c0_i32 = arith.constant 0 : i32
    %c0_i32_0 = arith.constant 0 : i32
    %c0_i32_1 = arith.constant 0 : i32
    return %arg0, %c0_i32, %c0_i32_0 : i32, i32, i32
  }
  func.func @transform_1(%arg0: i32, %arg1: i32) -> (i32, i32) {
    %c0_i32 = arith.constant 0 : i32
    %c0_i32_0 = arith.constant 0 : i32
    %c0_i32_1 = arith.constant 0 : i32
    return %c0_i32, %c0_i32_0 : i32, i32
  }
  func.func @transform_2(%arg0: i32, %arg1: i32) -> (i32, i32) {
    %c0_i32 = arith.constant 0 : i32
    %c0_i32_0 = arith.constant 0 : i32
    %c0_i32_1 = arith.constant 0 : i32
    return %c0_i32, %c0_i32_0 : i32, i32
  }
  func.func @transform_3(%arg0: i32, %arg1: i32) -> (i32, i32) {
    %c0_i32 = arith.constant 0 : i32
    %c0_i32_0 = arith.constant 0 : i32
    %c0_i32_1 = arith.constant 0 : i32
    return %c0_i32, %c0_i32_0 : i32, i32
  }
  func.func @transform_4(%arg0: i32, %arg1: i32) -> (i32, i32) {
    %c0_i32 = arith.constant 0 : i32
    %c0_i32_0 = arith.constant 0 : i32
    %c0_i32_1 = arith.constant 0 : i32
    return %c0_i32, %c0_i32_0 : i32, i32
  }
  func.func @transform_5(%arg0: i32, %arg1: i32) -> (i32, i32) {
    %c0_i32 = arith.constant 0 : i32
    %c0_i32_0 = arith.constant 0 : i32
    %c0_i32_1 = arith.constant 0 : i32
    return %c0_i32, %c0_i32_0 : i32, i32
  }
  func.func @transform_6(%arg0: i32, %arg1: i32) -> (i32, i32) {
    %c0_i32 = arith.constant 0 : i32
    %c0_i32_0 = arith.constant 0 : i32
    %c0_i32_1 = arith.constant 0 : i32
    return %c0_i32, %c0_i32_0 : i32, i32
  }
  func.func @transform_7(%arg0: i32, %arg1: i32) -> (i32, i32, i32, i32) {
    %c0_i32 = arith.constant 0 : i32
    %c0_i32_0 = arith.constant 0 : i32
    %c0_i32_1 = arith.constant 0 : i32
    return %arg0, %arg1, %c0_i32, %c0_i32_0 : i32, i32, i32, i32
  }
  func.func @transform_8(%arg0: i32, %arg1: i32) -> (i32, i32, i32, i32) {
    %c0_i32 = arith.constant 0 : i32
    %c0_i32_0 = arith.constant 0 : i32
    %c0_i32_1 = arith.constant 0 : i32
    return %arg0, %arg1, %c0_i32, %c0_i32_0 : i32, i32, i32, i32
  }
}

</mosaic_0001>

<bundles_post_ra>
// kernel: tpu_custom_call.1
= control target key start
LH: loop header
LB: loop body
LE: loop exit
PB: predicated region body
PF: predicated region fallthrough
CT: control target
= control target key end

     0   :  { %s3335_s0 = inlined_call_operand.vmem [shape: f32[2,1,384], index: 0, kind: input, shape index: {}]   ;;  %s3336_s1 = inlined_call_operand.vmem [shape: bf16[64,128], index: 1, kind: input, shape index: {}]   ;;  %s3337_s2 = inlined_call_operand.vmem [shape: f32[64,1], index: 2, kind: input, shape index: {}]   ;;  %s3338_s3 = inlined_call_operand.vmem [shape: bf16[256,64], index: 3, kind: input, shape index: {}]   ;;  %s3339_s4 = inlined_call_operand.vmem [shape: bf16[128,384], index: 4, kind: input, shape index: {}]   ;;  %s3340_s5 = inlined_call_operand.hbm [shape: bf16[256,128], index: 5, kind: input, shape index: {}]   ;;  %s3341_s6 = inlined_call_operand.vmem [shape: f32[1,128], index: 6, kind: input, shape index: {}]   ;;  %s3342_s7 = inlined_call_operand.hbm [shape: bf16[2,2,256,128], index: 7, kind: output, shape index: {0}]   ;;  %s3343_s8 = inlined_call_operand.hbm [shape: f32[2,2,64,128], index: 8, kind: output, shape index: {1}]  }
   0x1   :  { %3348 = sst [smem:[#allocation17_spill]] %s3335_s0 }
   0x2   :  { %3349 = sst [smem:[#allocation18_spill]] %s3336_s1 }
   0x3   :  { %3350 = sst [smem:[#allocation19_spill]] %s3337_s2 }
   0x4   :  { %3351 = sst [smem:[#allocation20_spill]] %s3340_s5 }
   0x5   :  { %14 = vsyncpa [#allocation5], 0 }
   0x6   :  { %15 = vsyncpa [#allocation6], 0 }
   0x7   :  { %17 = vsyncpa [#allocation6 + $0x1], 0 }
   0x8   :  { %18 = vsyncpa [#allocation9], 0 }
   0x9   :  { %20 = vsyncpa [#allocation9 + $0x1], 0  ;;  %s2815_s27 = smov 0   ;;  %s2817_s28 = smov 0  }
   0xa   :  { %s2819_s29 = smov 0   ;;  %s2821_s30 = smov 0  }
   0xb   :  { %s2823_s9 = smov 0   ;;  %s2825_s10 = smov 0  }
   0xc   :  { %s2827_s11 = smov 0   ;;  %s2829_s12 = smov 0  }
   0xd LB: > { %3352 = sst [smem:[#allocation13_spill]] %s2749_s10  ;;  %s1943_s13 = sadd.s32 4294967295, %s2757_s12   ;;  %s2757_s12 = sphi %s2829_s12, %s26_s12   ;;  %s2753_s11 = sphi %s2827_s11, %s3369_s11   ;;  %s2749_s10 = sphi %s2825_s10, %s3368_s10   ;;  %s2745_s9 = sphi %s2823_s9, %s3367_s9   ;;  %s2741_s30 = sphi %s2821_s30, %s3366_s30   ;;  %s2737_s29 = sphi %s2819_s29, %s3372_s29   ;;  %s2733_s28 = sphi %s2817_s28, %s3371_s28   ;;  %s2729_s27 = sphi %s2815_s27, %s3370_s27  }
   0xe   : > { %3353 = sst [smem:[#allocation14_spill]] %s2753_s11  ;;  %s1944_s14 = sadd.s32 4294967294, %s2757_s12  }
   0xf   : > { %s35_s15 = sadd.s32 1, %s2749_s10  ;;  %s38_s16 = sadd.s32 1, %s2753_s11 }
  0x10   : > { %p36_p0 = scmp.ge.s32.totalorder %s35_s15, 2  ;;  %s199_s17 = sadd.s32 1, %s2737_s29 }
  0x11   : > { %p209_p1 = scmp.ne.s32.totalorder %s2737_s29, %s2733_s28  ;;  %p210_p2 = scmp.eq.s32.totalorder %s1943_s13, 3 }
  0x12   : > { %s3374_s15 = smov (%p36_p0, %s35_s15), 0  ;;  %s3376_s16 = smov (!%p36_p0, %s38_s16), %s2753_s11 }
  0x13   : > { %3354 = sst [smem:[#allocation15_spill]] %s3374_s15  ;;  %s195_s18 = ssub.s32 %s2749_s10, %s3374_s15 }
  0x14   : > { %p2867_p3 = por %p210_p2, %p209_p1  ;;  %p40_p4 = scmp.ge.s32.totalorder %s3376_s16, 2 }
  0x15   : > { %p215_p5 = scmp.ne.s32.totalorder %s2733_s28, %s2729_s27  ;;  %p216_p6 = scmp.eq.s32.totalorder %s1944_s14, 3 }
  0x16   : > { %p1945_p7 = scmp.ge.s32.totalorder %s2757_s12, 1  ;;  %s3378_s16 = smov (%p40_p4, %s3376_s16), 0 }
  0x17   : > { %3356 = sst [smem:[#allocation16_spill]] %s3378_s16  ;;  %p2876_p8 = por %p216_p6, %p215_p5 }
  0x18   : > { %p251_p9 = scmp.lt.s32.totalorder %s2757_s12, 5  ;;  %s194_s21 = ssub.s32 %s2753_s11, %s3378_s16 }
  0x19   : > { %s196_s22 = sor.u32 %s195_s18, %s194_s21  ;;  %p2887_p12 = scmp.eq.s32.totalorder %s1943_s13, 0 }
  0x1a   : > { %p2883_p10 = pnand %p1945_p7, %p251_p9  ;;  %p197_p11 = scmp.eq.s32.totalorder %s196_s22, 0 }
  0x1b   : > { %s2759_s26 = smov [#allocation4]  }
  0x1c   : > { %p2392_p13 = pneg %p2883_p10  ;;  %s275_s14 = sshll.u32 %s2759_s26, 4  ;;  %s276_s14 = int_to_ptr.vmem [resolvable:$true] %s275_s14 }
  0x1d   : > { %s2894_s25 = scalar_select %p197_p11, %s2737_s29, %s199_s17  }
  0x1e   : > { %p2898_p0 = pnand %p2887_p12, %p2392_p13  ;;  %s2616_s13 = scalar_lea.vmem %s276_s14, 2048 }
  0x1f   : > { %p2617_p2 = scmp.ne.s32.totalorder %s276_s14, %s2616_s13  ;;  %p2624_p6 = scmp.lt.s32.totalorder %s276_s14, %s276_s14 }
  0x20   : > { %p2607_p1 = pneg %p2898_p0  ;;  %p2625_p7 = scmp.lt.s32.totalorder %s2616_s13, %s2616_s13 }
  0x22   : > { %p2619_p4 = pnand %p2617_p2, %p2607_p1  ;;  %p2626_p9 = por %p2625_p7, %p2624_p6 }
  0x24   : > { %p2620_p5 = pneg %p2619_p4 }
  0x26   : > { %p2627_p11 = pnand %p2626_p9, %p2620_p5 }
  0x28   : > { %2630 = shalt.err (!%p2627_p11)
}
  0x29   : > { %s2760_s17 = smov 64   ;;  %s2761_s21 = smov 4  }
  0x2a   : > { %s3361_s5 = sld [smem:[#allocation20_spill]] }
  0x2c   : > { %301 = sbr.rel (%p2883_p10) target bundleno = 1124 (0x464), region = 48 }
  0x30   : > { %2395 = dma.hbm_to_vmem [thread:$0]  (!%p2898_p0), %s3361_s5, 2048, %s276_s14, [#allocation5], %s2760_s17, %s2760_s17, %s2761_s21  }
  0x31   : > { %2716 = dma.done.wait (%p2887_p12), [#allocation5], 2048  }
  0x32   : > { %2718 = vsyncadd (%p2887_p12), [#allocation5], 4294965248  ;;  %p339_p13 = scmp.lt.s32.totalorder %s2745_s9, 1  ;;  %s2917_s13 = sand.u32 1, %s2733_s28  }
  0x33   : > { %s1950_s18 = sshll.u32 %s2917_s13, 7  ;;  %s1951_s22 = sshll.u32 %s2917_s13, 6 }
  0x34   : > { %s340_s14 = scalar_select %p339_p13, %s2745_s9, 1 }
  0x35   : > { %s3362_s0 = sld [smem:[#allocation17_spill]]  ;;  %s2927_s24 = scalar_lea.vmem [#allocation7], %s1950_s18 }
  0x36   : > { %s2383_s17 = smul.u32 3, %s340_s14  ;;  %s2929_s5 = scalar_lea.vmem [#allocation8], %s1951_s22 }
  0x37   : > { %p1952_p10 = scmp.ne.s32.totalorder %s2741_s30, 0 }
  0x38   : > { %s3363_s1 = sld [smem:[#allocation18_spill]] (!%p1952_p10) }
  0x39   : > { %348 = sbr.rel (%p1952_p10) target bundleno = 306 (0x132), region = 56  ;;  %s3364_s2 = sld [smem:[#allocation19_spill]] (!%p1952_p10) }
  0x3b   : > { %s342_s26 = scalar_lea.vmem %s3362_s0, %s2383_s17 }
  0x3c   : > { %v2925_v0 = vld [vmem:[%s342_s26] sm:$0x7] }
  0x3e   : > { %v2479_v1 = vld [vmem:[%s3339_s4 + $0xac] ss:$12 sps:$4 sm:$0xff]   ;;  %v2481_v2 = vld [vmem:[%s3339_s4 + $0xa8] ss:$12 sps:$4 sm:$0xff]   ;;  %v2762_v3 = vmov 0   ;;  %v2503_v18 = vld [vmem:[%s3363_s1] sm:$0xff]   ;;  %v374_v30 = vlaneseq }
  0x3f   : > { %515 = vmatprep.mubr.bf16.mxu0 %v2762_v3  ;;  %531 = vmatprep.mubr.bf16.mxu1 %v2762_v3  ;;  %v2482_v4 = vld [vmem:[%s3339_s4 + $0x94] ss:$12 sps:$4 sm:$0xff]   ;;  %v2484_v5 = vld [vmem:[%s3339_s4 + $0x90] ss:$12 sps:$4 sm:$0xff]   ;;  %v2487_v7 = vld [vmem:[%s3339_s4 + $0x78] ss:$12 sps:$4 sm:$0xff]  }
  0x40   : > { %483 = vmatprep.subr.bf16.mxu0 %v2479_v1  ;;  %2359 = vmatprep.subr.bf16.mxu1 %v2479_v1  ;;  %v2485_v6 = vld [vmem:[%s3339_s4 + $0x7c] ss:$12 sps:$4 sm:$0xff]   ;;  %v2488_v8 = vld [vmem:[%s3339_s4 + $0x64] ss:$12 sps:$4 sm:$0xff]   ;;  %v2490_v9 = vld [vmem:[%s3339_s4 + $0x60] ss:$12 sps:$4 sm:$0xff]  }
  0x41   : > { %484 = vmatpush1.bf16.msra.mxu0 %v2481_v2  ;;  %2367 = vmatpush1.bf16.msra.mxu1 %v2481_v2  ;;  %v2491_v10 = vld [vmem:[%s3339_s4 + $0x4c] ss:$12 sps:$4 sm:$0xff]   ;;  %v2493_v11 = vld [vmem:[%s3339_s4 + $0x48] ss:$12 sps:$4 sm:$0xff]   ;;  %v2496_v13 = vld [vmem:[%s3339_s4 + $0x30] ss:$12 sps:$4 sm:$0xff]  }
  0x42   : > { %485 = vmatprep.subr.bf16.mxu0 %v2482_v4  ;;  %2360 = vmatprep.subr.bf16.mxu1 %v2482_v4  ;;  %v2494_v12 = vld [vmem:[%s3339_s4 + $0x34] ss:$12 sps:$4 sm:$0xff]   ;;  %v2497_v14 = vld [vmem:[%s3339_s4 + $0x1c] ss:$12 sps:$4 sm:$0xff]   ;;  %v2499_v15 = vld [vmem:[%s3339_s4 + $0x18] ss:$12 sps:$4 sm:$0xff]  }
  0x43   : > { %v2500_v16 = vld [vmem:[%s3339_s4 + $0x4] ss:$12 sps:$4 sm:$0xff]   ;;  %v2502_v17 = vld [vmem:[%s3339_s4] ss:$12 sps:$4 sm:$0xff]   ;;  %v2506_v21 = vld [vmem:[%s3363_s1 + $0x18] sm:$0xff]   ;;  %vm572_vm0 = vcmask 7168  }
  0x44   : > { %v2504_v19 = vld [vmem:[%s3363_s1 + $0x10] sm:$0xff]   ;;  %v2505_v20 = vld [vmem:[%s3363_s1 + $0x8] sm:$0xff]   ;;  %v564_v22 = vld [vmem:[%s3364_s2] sm:$0xff]  ;;  %v375_v31 = vshrl.u32 %v374_v30, 7 }
  0x45   : > { %486 = vmatpush1.bf16.msra.mxu0 %v2484_v5  ;;  %2368 = vmatpush1.bf16.msra.mxu1 %v2484_v5  ;;  %v565_v23 = vld [vmem:[%s3364_s2 + $0x8] sm:$0xff]  ;;  %v566_v24 = vld [vmem:[%s3364_s2 + $0x10] sm:$0xff]  ;;  %v567_v25 = vld [vmem:[%s3364_s2 + $0x18] sm:$0xff]  ;;  %573 = vst.msk [vmem:[#allocation3] sm:$0xff] %vm572_vm0, %v564_v22 }
  0x46   : > { %487 = vmatprep.subr.bf16.mxu0 %v2485_v6  ;;  %2361 = vmatprep.subr.bf16.mxu1 %v2485_v6  ;;  %v568_v26 = vld [vmem:[%s3364_s2 + $0x20] sm:$0xff]  ;;  %v569_v27 = vld [vmem:[%s3364_s2 + $0x28] sm:$0xff]  ;;  %574 = vst.msk [vmem:[#allocation3 + $0x8] sm:$0xff] %vm572_vm0, %v565_v23  ;;  %575 = vst.msk [vmem:[#allocation3 + $0x10] sm:$0xff] %vm572_vm0, %v566_v24  ;;  %v376_v32 = vsub.s32 0, %v375_v31 }
  0x47   : > { %v570_v28 = vld [vmem:[%s3364_s2 + $0x30] sm:$0xff]  ;;  %v571_v29 = vld [vmem:[%s3364_s2 + $0x38] sm:$0xff]  ;;  %576 = vst.msk [vmem:[#allocation3 + $0x18] sm:$0xff] %vm572_vm0, %v567_v25  ;;  %577 = vst.msk [vmem:[#allocation3 + $0x20] sm:$0xff] %vm572_vm0, %v568_v26 }
  0x48   : > { %578 = vst.msk [vmem:[#allocation3 + $0x28] sm:$0xff] %vm572_vm0, %v569_v27  ;;  %579 = vst.msk [vmem:[#allocation3 + $0x30] sm:$0xff] %vm572_vm0, %v570_v28  ;;  %v377_v33 = vrot.slane %v2925_v0, %v376_v32 }
  0x49   : > { %488 = vmatpush1.bf16.msra.mxu0 %v2487_v7  ;;  %2369 = vmatpush1.bf16.msra.mxu1 %v2487_v7  ;;  %580 = vst.msk [vmem:[#allocation3 + $0x38] sm:$0xff] %vm572_vm0, %v571_v29 }
  0x4a   : > { %489 = vmatprep.subr.bf16.mxu0 %v2488_v8  ;;  %2362 = vmatprep.subr.bf16.mxu1 %v2488_v8 }
  0x4d   : > { %490 = vmatpush1.bf16.msra.mxu0 %v2490_v9  ;;  %2370 = vmatpush1.bf16.msra.mxu1 %v2490_v9 }
  0x4e   : > { %491 = vmatprep.subr.bf16.mxu0 %v2491_v10  ;;  %2363 = vmatprep.subr.bf16.mxu1 %v2491_v10 }
  0x51   : > { %492 = vmatpush1.bf16.msra.mxu0 %v2493_v11  ;;  %2371 = vmatpush1.bf16.msra.mxu1 %v2493_v11 }
  0x52   : > { %493 = vmatprep.subr.bf16.mxu0 %v2494_v12  ;;  %2364 = vmatprep.subr.bf16.mxu1 %v2494_v12 }
  0x55   : > { %494 = vmatpush1.bf16.msra.mxu0 %v2496_v13  ;;  %2372 = vmatpush1.bf16.msra.mxu1 %v2496_v13 }
  0x56   : > { %495 = vmatprep.subr.bf16.mxu0 %v2497_v14  ;;  %2365 = vmatprep.subr.bf16.mxu1 %v2497_v14 }
  0x59   : > { %496 = vmatpush1.bf16.msra.mxu0 %v2499_v15  ;;  %2373 = vmatpush1.bf16.msra.mxu1 %v2499_v15 }
  0x5a   : > { %497 = vmatprep.subr.bf16.mxu0 %v2500_v16  ;;  %2366 = vmatprep.subr.bf16.mxu1 %v2500_v16 }
  0x5d   : > { %498 = vmatpush1.bf16.msra.mxu0 %v2502_v17  ;;  %2374 = vmatpush1.bf16.msra.mxu1 %v2502_v17 }
  0x60   : > { %516 = vmatmul.mubr.bf16.vlgmr.msra.gmra.mxu0 %v2503_v18  ;;  %532 = vmatmul.mubr.bf16.vlgmr.msra.gmra.mxu1 %v2504_v19 }
  0x61   : > { %523 = vmatprep.mubr.bf16.mxu0 %v2762_v3  ;;  %539 = vmatprep.mubr.bf16.mxu1 %v2762_v3 }
  0x68   : > { %524 = vmatmul.mubr.bf16.gmra.mxu0 %v2505_v20  ;;  %540 = vmatmul.mubr.bf16.gmra.mxu1 %v2506_v21 }
 0x120   : > { %v517_v34 = vpop.f32.mrf.mxu0  ;;  %v533_v35 = vpop.f32.mrf.mxu1 }
 0x121   : > { %v518_v36 = vadd.f32 %v517_v34, %v377_v33  ;;  %v534_v37 = vadd.f32 %v533_v35, %v377_v33 }
 0x122   : > { %v519_v38 = vpop.f32.mrf.mxu0  ;;  %v535_v39 = vpop.f32.mrf.mxu1 }
 0x123   : > { %v548_v40 = vmax.f32 %v518_v36, 0.0  ;;  %v552_v41 = vmax.f32 %v534_v37, 0.0 }
 0x124   : > { %v520_v42 = vpop.f32.mrf.mxu0  ;;  %v536_v43 = vpop.f32.mrf.mxu1 }
 0x125   : > { %556 = vst [vmem:[#allocation2 + $0x30] sm:$0xff] %v548_v40  ;;  %560 = vst [vmem:[#allocation2 + $0x8] sm:$0xff] %v552_v41  ;;  %v521_v44 = vadd.f32 %v520_v42, %v377_v33  ;;  %v537_v45 = vadd.f32 %v536_v43, %v377_v33 }
 0x126   : > { %v522_v46 = vpop.f32.mrf.mxu0  ;;  %v538_v47 = vpop.f32.mrf.mxu1 }
 0x127   : > { %v549_v48 = vmax.f32 %v521_v44, 0.0  ;;  %v553_v49 = vmax.f32 %v537_v45, 0.0 }
 0x128   : > { %v525_v50 = vpop.f32.mrf.mxu0  ;;  %v541_v51 = vpop.f32.mrf.mxu1 }
 0x129   : > { %557 = vst [vmem:[#allocation2] sm:$0xff] %v549_v48  ;;  %561 = vst [vmem:[#allocation2 + $0x20] sm:$0xff] %v553_v49  ;;  %v526_v52 = vadd.f32 %v525_v50, %v377_v33  ;;  %v542_v53 = vadd.f32 %v541_v51, %v377_v33 }
 0x12a   : > { %v527_v54 = vpop.f32.mrf.mxu0  ;;  %v543_v55 = vpop.f32.mrf.mxu1 }
 0x12b   : > { %v550_v56 = vmax.f32 %v526_v52, 0.0  ;;  %v554_v57 = vmax.f32 %v542_v53, 0.0 }
 0x12c   : > { %v528_v58 = vpop.f32.mrf.mxu0  ;;  %v544_v59 = vpop.f32.mrf.mxu1 }
 0x12d   : > { %558 = vst [vmem:[#allocation2 + $0x18] sm:$0xff] %v550_v56  ;;  %562 = vst [vmem:[#allocation2 + $0x28] sm:$0xff] %v554_v57  ;;  %v529_v60 = vadd.f32 %v528_v58, %v377_v33  ;;  %v545_v61 = vadd.f32 %v544_v59, %v377_v33 }
 0x12e   : > { %v530_v62 = vpop.f32.mrf.mxu0  ;;  %v546_v63 = vpop.f32.mrf.mxu1 }
 0x12f   : > { %v551_v1 = vmax.f32 %v529_v60, 0.0  ;;  %v555_v2 = vmax.f32 %v545_v61, 0.0 }
 0x131   : > { %559 = vst [vmem:[#allocation2 + $0x10] sm:$0xff] %v551_v1  ;;  %563 = vst [vmem:[#allocation2 + $0x38] sm:$0xff] %v555_v2 }
 0x132 PF: > { %v595_v3 = vld [vmem:[#allocation3 + $0x30] sm:$0xff]  ;;  %v593_v4 = vld [vmem:[#allocation3 + $0x20] sm:$0xff]  ;;  %v596_v5 = vld [vmem:[#allocation3 + $0x38] sm:$0xff]  ;;  %v2763_v6 = vmov 0   ;;  %vm809_vm1 = vcmask 523264   ;;  %s2088_s22 = sshll.u32 %s2741_s30, 5 }
 0x133   : > { %2508 = vset.pattern.permute.xlu1 %v2763_v6  ;;  %2507 = vset.pattern.permute.xlu0 %v2763_v6  ;;  %v1979_v7 = vmul.f32 -1.442695, %v595_v3  ;;  %v1977_v8 = vmul.f32 -1.442695, %v593_v4  ;;  %v1980_v9 = vmul.f32 -1.442695, %v596_v5 }
 0x134   : > { %v594_v10 = vld [vmem:[#allocation3 + $0x28] sm:$0xff]  ;;  %v592_v11 = vld [vmem:[#allocation3 + $0x18] sm:$0xff]  ;;  %v591_v12 = vld [vmem:[#allocation3 + $0x10] sm:$0xff]  ;;  %s2089_s17 = sshll.u32 %s2745_s9, 6  ;;  %s1802_s16 = sshll.u32 %s2927_s24, 4  ;;  %s3240_s16 = int_to_ptr.vmem [resolvable:$true] %s1802_s16 }
 0x135   : > { %2573 = vpow2.f32 %v1979_v7  ;;  %v1978_v13 = vmul.f32 -1.442695, %v594_v10  ;;  %v1976_v14 = vmul.f32 -1.442695, %v592_v11  ;;  %v1975_v15 = vmul.f32 -1.442695, %v591_v12  ;;  %s1799_s15 = sadd.s32 %s2089_s17, %s2088_s22 }
 0x136   : > { %2575 = vpow2.f32 %v1977_v8  ;;  %v590_v16 = vld [vmem:[#allocation3 + $0x8] sm:$0xff]  ;;  %v589_v17 = vld [vmem:[#allocation3] sm:$0xff]  ;;  %v3035_v57 = vld [vmem:[#allocation2 + $0x18] sm:$0xff]  ;;  %s2090_s11 = sshll.u32 %s1799_s15, 6  ;;  %s1782_s18 = scalar_lea.sflag [#allocation6], %s2917_s13 }
 0x137   : > { %2577 = vpow2.f32 %v1980_v9  ;;  %v1974_v18 = vmul.f32 -1.442695, %v590_v16  ;;  %v1973_v19 = vmul.f32 -1.442695, %v589_v17  ;;  %v2509_v44 = vld [vmem:[%s3338_s3 + $0x40] sm:$0xff]   ;;  %v3023_v47 = vld [vmem:[#allocation2 + $0x28] sm:$0xff]  ;;  %s3238_s26 = scalar_lea.hbm %s3342_s7, %s2090_s11 }
 0x138   : > { %2579 = vpow2.f32 %v1978_v13  ;;  %2319 = vmatprep.mubr.msk.bf16.mxu1 %vm809_vm1, %v2509_v44  ;;  %v3025_v48 = vld [vmem:[#allocation2 + $0x8] sm:$0xff]  ;;  %v3027_v49 = vld [vmem:[#allocation2 + $0x38] sm:$0xff]  ;;  %v3029_v50 = vld [vmem:[#allocation2 + $0x20] sm:$0xff]  ;;  %s2631_s14 = scalar_lea.vmem %s3240_s16, 2048  ;;  %s2764_s22 = smov [#allocation7]  }
 0x139   : > { %2581 = vpow2.f32 %v1976_v14  ;;  %v3037_v59 = vld [vmem:[#allocation2 + $0x10] sm:$0xff]  ;;  %v3043_v3 = vld [vmem:[#allocation2] sm:$0xff]  ;;  %v2513_v11 = vld [vmem:[%s3339_s4 + $0xac] ss:$12 sps:$4 sm:$0xff]   ;;  %v1182_v44 = vpack.c.bf16 %v3027_v49, %v3023_v47  ;;  %p2632_p12 = scmp.ne.s32.totalorder %s3240_s16, %s2631_s14  ;;  %s2635_s17 = sshll.u32 %s2764_s22, 4  ;;  %s2636_s17 = int_to_ptr.vmem [resolvable:$false] %s2635_s17 }
 0x13a   : > { %2583 = vpow2.f32 %v1975_v15  ;;  %v3041_v2 = vld [vmem:[#allocation2 + $0x30] sm:$0xff]  ;;  %v2510_v12 = vld [vmem:[%s3338_s3 + $0x48] sm:$0xff]   ;;  %p2638_p2 = scmp.lt.s32.totalorder %s3240_s16, %s2636_s17 }
 0x13b   : > { %2585 = vpow2.f32 %v1974_v18  ;;  %v2511_v13 = vld [vmem:[%s3339_s4 + $0xa8] ss:$12 sps:$4 sm:$0xff]   ;;  %v2514_v16 = vld [vmem:[%s3339_s4 + $0x90] ss:$12 sps:$4 sm:$0xff]   ;;  %p2633_p0 = pnand %p2632_p12, %p2867_p3 }
 0x13c   : > { %2587 = vpow2.f32 %v1973_v19  ;;  %v2517_v14 = vld [vmem:[%s3338_s3 + $0x50] sm:$0xff]   ;;  %v2521_v17 = vld [vmem:[%s3339_s4 + $0x7c] ss:$12 sps:$4 sm:$0xff]   ;;  %v2519_v19 = vld [vmem:[%s3339_s4 + $0x78] ss:$12 sps:$4 sm:$0xff]  }
 0x13d   : > { %v2516_v15 = vld [vmem:[%s3339_s4 + $0x94] ss:$12 sps:$4 sm:$0xff]   ;;  %v2518_v18 = vld [vmem:[%s3338_s3 + $0x58] sm:$0xff]   ;;  %p2634_p1 = pneg %p2633_p0 }
 0x142   : > { %v2574_v20 = vpop.eup %2573 }
 0x143   : > { %v2576_v21 = vpop.eup %2575  ;;  %v627_v22 = vadd.f32 1.0, %v2574_v20  ;;  %v2525_v20 = vld [vmem:[%s3338_s3 + $0x60] sm:$0xff]  }
 0x144   : > { %v2578_v23 = vpop.eup %2577  ;;  %v625_v24 = vadd.f32 1.0, %v2576_v21  ;;  %v2524_v21 = vld [vmem:[%s3339_s4 + $0x64] ss:$12 sps:$4 sm:$0xff]  }
 0x145   : > { %v2580_v25 = vpop.eup %2579  ;;  %2589 = vrcp.f32 %v627_v22  ;;  %v628_v26 = vadd.f32 1.0, %v2578_v23  ;;  %v2522_v22 = vld [vmem:[%s3339_s4 + $0x60] ss:$12 sps:$4 sm:$0xff]  }
 0x146   : > { %v2582_v27 = vpop.eup %2581  ;;  %2591 = vrcp.f32 %v625_v24  ;;  %v626_v28 = vadd.f32 1.0, %v2580_v25  ;;  %v2529_v23 = vld [vmem:[%s3339_s4 + $0x4c] ss:$12 sps:$4 sm:$0xff]   ;;  %v2527_v25 = vld [vmem:[%s3339_s4 + $0x48] ss:$12 sps:$4 sm:$0xff]  }
 0x147   : > { %v2584_v29 = vpop.eup %2583  ;;  %2593 = vrcp.f32 %v628_v26  ;;  %v624_v31 = vadd.f32 1.0, %v2582_v27  ;;  %v2526_v24 = vld [vmem:[%s3338_s3 + $0x68] sm:$0xff]   ;;  %v2533_v26 = vld [vmem:[%s3338_s3 + $0x70] sm:$0xff]  }
 0x148   : > { %v2586_v30 = vpop.eup %2585  ;;  %2595 = vrcp.f32 %v626_v28  ;;  %v623_v32 = vadd.f32 1.0, %v2584_v29  ;;  %v2532_v27 = vld [vmem:[%s3339_s4 + $0x34] ss:$12 sps:$4 sm:$0xff]   ;;  %v2530_v28 = vld [vmem:[%s3339_s4 + $0x30] ss:$12 sps:$4 sm:$0xff]  }
 0x149   : > { %v2588_v33 = vpop.eup %2587  ;;  %v622_v34 = vadd.f32 1.0, %v2586_v30  ;;  %v2537_v29 = vld [vmem:[%s3339_s4 + $0x1c] ss:$12 sps:$4 sm:$0xff]  }
 0x14a   : > { %v621_v35 = vadd.f32 1.0, %v2588_v33  ;;  %2597 = vrcp.f32 %v623_v32  ;;  %v2534_v30 = vld [vmem:[%s3338_s3 + $0x78] sm:$0xff]   ;;  %v2540_v32 = vld [vmem:[%s3339_s4 + $0x4] ss:$12 sps:$4 sm:$0xff]   ;;  %v2538_v33 = vld [vmem:[%s3339_s4] ss:$12 sps:$4 sm:$0xff]  }
 0x14b   : > { %2599 = vrcp.f32 %v624_v31  ;;  %v2535_v31 = vld [vmem:[%s3339_s4 + $0x18] ss:$12 sps:$4 sm:$0xff]  }
 0x14c   : > { %2601 = vrcp.f32 %v621_v35  ;;  %v1179_v35 = vpack.c.bf16 %v3043_v3, %v3041_v2 }
 0x14d   : > { %2603 = vrcp.f32 %v622_v34  ;;  %v2541_v34 = vld [vmem:[%s3339_s4 + $0xb0] ss:$12 sps:$4 sm:$0xff]  }
 0x152   : > { %v2590_v36 = vpop.eup %2589 }
 0x153   : > { %v2592_v37 = vpop.eup %2591  ;;  %677 = vperm.xlu0 %2507, %v2590_v36   ;;  %v2542_v36 = vld [vmem:[%s3339_s4 + $0x98] ss:$12 sps:$4 sm:$0xff]  }
 0x154   : > { %v2594_v38 = vpop.eup %2593  ;;  %667 = vperm.xlu1 %2508, %v2592_v37   ;;  %v2543_v37 = vld [vmem:[%s3339_s4 + $0x80] ss:$12 sps:$4 sm:$0xff]  }
 0x155   : > { %v2596_v39 = vpop.eup %2595 }
 0x157   : > { %682 = vperm.xlu0 %2507, %v2594_v38   ;;  %v2598_v40 = vpop.eup %2597  ;;  %v1180_v38 = vpack.c.bf16 %v3037_v59, %v3035_v57 }
 0x158   : > { %672 = vperm.xlu1 %2508, %v2596_v39   ;;  %v2600_v41 = vpop.eup %2599  ;;  %v2544_v39 = vld [vmem:[%s3339_s4 + $0x68] ss:$12 sps:$4 sm:$0xff]  }
 0x159   : > { %v2602_v42 = vpop.eup %2601 }
 0x15a   : > { %v2604_v43 = vpop.eup %2603 }
 0x15b   : > { %657 = vperm.xlu0 %2507, %v2598_v40   ;;  %v2545_v40 = vld [vmem:[%s3339_s4 + $0x50] ss:$12 sps:$4 sm:$0xff]  }
 0x15c   : > { %662 = vperm.xlu1 %2508, %v2600_v41   ;;  %v1181_v41 = vpack.c.bf16 %v3029_v50, %v3025_v48 }
 0x15f   : > { %647 = vperm.xlu0 %2507, %v2602_v42   ;;  %v2546_v42 = vld [vmem:[%s3339_s4 + $0x38] ss:$12 sps:$4 sm:$0xff]  }
 0x160   : > { %652 = vperm.xlu1 %2508, %v2604_v43   ;;  %v2547_v43 = vld [vmem:[%s3339_s4 + $0x20] ss:$12 sps:$4 sm:$0xff]  }
 0x1ce   : > { %v678_v45 = vpop.permute.xlu0 %677 }
 0x1cf   : > { %v668_v46 = vpop.permute.xlu1 %667  ;;  %v691_v52 = vmul.f32 %v678_v45, %v3023_v47  ;;  %v2548_v45 = vld [vmem:[%s3339_s4 + $0x8] ss:$12 sps:$4 sm:$0xff]   ;;  %v2551_v47 = vld [vmem:[#allocation4 + $0x78] sm:$0xff]  }
 0x1d0   : > { %v689_v53 = vmul.f32 %v668_v46, %v3025_v48  ;;  %v2550_v46 = vld [vmem:[%s3338_s3 + $0x8] sm:$0xff]   ;;  %v2552_v48 = vld [vmem:[#allocation4 + $0x38] sm:$0xff]  }
 0x1d2   : > { %v683_v51 = vpop.permute.xlu0 %682 }
 0x1d3   : > { %v692_v54 = vmul.f32 %v683_v51, %v3027_v49  ;;  %v673_v55 = vpop.permute.xlu1 %672  ;;  %v2553_v49 = vld [vmem:[%s3338_s3 + $0x10] sm:$0xff]  }
 0x1d4   : > { %v690_v56 = vmul.f32 %v673_v55, %v3029_v50  ;;  %v2554_v50 = vld [vmem:[%s3338_s3 + $0x18] sm:$0xff]   ;;  %v2555_v51 = vld [vmem:[#allocation4 + $0x70] sm:$0xff]   ;;  %v2559_v55 = vld [vmem:[%s3338_s3 + $0x20] sm:$0xff]  }
 0x1d5   : > { %v696_v58 = vpack.c.bf16 %v692_v54, %v691_v52  ;;  %v2556_v52 = vld [vmem:[#allocation4 + $0x30] sm:$0xff]   ;;  %v2558_v54 = vld [vmem:[#allocation4 + $0x28] sm:$0xff]  }
 0x1d6   : > { %v658_v60 = vpop.permute.xlu0 %657  ;;  %v695_v61 = vpack.c.bf16 %v690_v56, %v689_v53  ;;  %v2557_v53 = vld [vmem:[#allocation4 + $0x68] sm:$0xff]  }
 0x1d7   : > { %v663_v62 = vpop.permute.xlu1 %662  ;;  %v687_v63 = vmul.f32 %v658_v60, %v3035_v57  ;;  %2295 = vmatprep.subr.bf16.mxu0 %v696_v58  ;;  %2375 = vmatprep.subr.bf16.mxu1 %v696_v58  ;;  %v2560_v56 = vld [vmem:[%s3338_s3 + $0x28] sm:$0xff]   ;;  %v2561_v57 = vld [vmem:[#allocation4 + $0x60] sm:$0xff]   ;;  %v2564_v60 = vld [vmem:[#allocation4 + $0x18] sm:$0xff]  }
 0x1d8   : > { %v688_v1 = vmul.f32 %v663_v62, %v3037_v59  ;;  %2296 = vmatpush3.bf16.msra.mxu0 %v696_v58  ;;  %2379 = vmatpush3.bf16.msra.mxu1 %v696_v58  ;;  %v2562_v58 = vld [vmem:[#allocation4 + $0x20] sm:$0xff]   ;;  %v2563_v59 = vld [vmem:[#allocation4 + $0x58] sm:$0xff]  }
 0x1d9   : > { %2297 = vmatprep.subr.bf16.mxu0 %v695_v61  ;;  %2376 = vmatprep.subr.bf16.mxu1 %v695_v61  ;;  %v2566_v62 = vld [vmem:[%s3338_s3 + $0x38] sm:$0xff]  }
 0x1da   : > { %v648_v4 = vpop.permute.xlu0 %647  ;;  %v694_v5 = vpack.c.bf16 %v688_v1, %v687_v63  ;;  %v2567_v63 = vld [vmem:[#allocation4 + $0x50] sm:$0xff]  }
 0x1db   : > { %v653_v7 = vpop.permute.xlu1 %652  ;;  %v685_v8 = vmul.f32 %v648_v4, %v3041_v2  ;;  %v2568_v1 = vld [vmem:[#allocation4 + $0x10] sm:$0xff]   ;;  %v2569_v2 = vld [vmem:[#allocation4 + $0x48] sm:$0xff]   ;;  %v2571_v4 = vld [vmem:[#allocation4 + $0x40] sm:$0xff]  }
 0x1dc   : > { %v686_v9 = vmul.f32 %v653_v7, %v3043_v3  ;;  %2298 = vmatpush3.bf16.msra.mxu0 %v695_v61  ;;  %2380 = vmatpush3.bf16.msra.mxu1 %v695_v61  ;;  %v2565_v61 = vld [vmem:[%s3338_s3 + $0x30] sm:$0xff]   ;;  %v2570_v3 = vld [vmem:[#allocation4 + $0x8] sm:$0xff]  }
 0x1dd   : > { %2299 = vmatprep.subr.bf16.mxu0 %v694_v5  ;;  %2377 = vmatprep.subr.bf16.mxu1 %v694_v5 }
 0x1de   : > { %v693_v10 = vpack.c.bf16 %v686_v9, %v685_v8 }
 0x1e0   : > { %2300 = vmatpush3.bf16.msra.mxu0 %v694_v5  ;;  %2381 = vmatpush3.bf16.msra.mxu1 %v694_v5  ;;  %v2572_v5 = vld [vmem:[#allocation4] sm:$0xff]  }
 0x1e1   : > { %2301 = vmatprep.subr.bf16.mxu0 %v693_v10  ;;  %2378 = vmatprep.subr.bf16.mxu1 %v693_v10 }
 0x1e4   : > { %2302 = vmatpush3.bf16.msra.mxu0 %v693_v10  ;;  %2382 = vmatpush3.bf16.msra.mxu1 %v693_v10 }
 0x1e5   : > { %1359 = vmatprep.subr.bf16.mxu1 %v2513_v11  ;;  %2255 = vmatprep.subr.bf16.mxu0 %v2551_v47 }
 0x1e7   : > { %2320 = vmatmul.mubr.msk.bf16.vlgmr.msra.gmra.mxu1 %vm809_vm1, %v2510_v12 }
 0x1e8   : > { %1360 = vmatpush1.bf16.msra.mxu1 %v2511_v13  ;;  %2323 = vmatprep.mubr.msk.bf16.mxu1 %vm809_vm1, %v2517_v14 }
 0x1e9   : > { %1361 = vmatprep.subr.bf16.mxu1 %v2516_v15 }
 0x1ec   : > { %1362 = vmatpush1.bf16.msra.mxu1 %v2514_v16 }
 0x1ed   : > { %1363 = vmatprep.subr.bf16.mxu1 %v2521_v17 }
 0x1ef   : > { %2324 = vmatmul.mubr.msk.bf16.gmra.mxu1 %vm809_vm1, %v2518_v18 }
 0x1f0   : > { %1364 = vmatpush1.bf16.msra.mxu1 %v2519_v19  ;;  %2327 = vmatprep.mubr.msk.bf16.mxu1 %vm809_vm1, %v2525_v20  ;;  %v1216_v20 = vlaneseq }
 0x1f1   : > { %1365 = vmatprep.subr.bf16.mxu1 %v2524_v21 }
 0x1f4   : > { %1366 = vmatpush1.bf16.msra.mxu1 %v2522_v22 }
 0x1f5   : > { %1367 = vmatprep.subr.bf16.mxu1 %v2529_v23 }
 0x1f7   : > { %2328 = vmatmul.mubr.msk.bf16.gmra.mxu1 %vm809_vm1, %v2526_v24  ;;  %v1217_v24 = vshrl.u32 %v1216_v20, 7 }
 0x1f8   : > { %1368 = vmatpush1.bf16.msra.mxu1 %v2527_v25  ;;  %2331 = vmatprep.mubr.msk.bf16.mxu1 %vm809_vm1, %v2533_v26 }
 0x1f9   : > { %1369 = vmatprep.subr.bf16.mxu1 %v2532_v27 }
 0x1fc   : > { %1370 = vmatpush1.bf16.msra.mxu1 %v2530_v28  ;;  %v1218_v28 = vsub.s32 0, %v1217_v24 }
 0x1fd   : > { %1371 = vmatprep.subr.bf16.mxu1 %v2537_v29 }
 0x1ff   : > { %2332 = vmatmul.mubr.msk.bf16.gmra.mxu1 %vm809_vm1, %v2534_v30 }
 0x200   : > { %1372 = vmatpush1.bf16.msra.mxu1 %v2535_v31  ;;  %1391 = vmatprep.mubr.bf16.mxu1 %v2763_v6 }
 0x201   : > { %1373 = vmatprep.subr.bf16.mxu1 %v2540_v32  ;;  %v1219_v32 = vrot.slane %v2925_v0, %v1218_v28 }
 0x204   : > { %1374 = vmatpush1.bf16.msra.mxu1 %v2538_v33 }
 0x205   : > { %2335 = vmatprep.subr.bf16.mxu1 %v2541_v34 }
 0x207   : > { %1392 = vmatmul.mubr.bf16.vlgmr.msra.gmra.mxu1 %v1179_v35 }
 0x208   : > { %2336 = vmatpush3.bf16.msra.mxu1 %v2541_v34  ;;  %1401 = vmatprep.mubr.bf16.mxu1 %v2763_v6 }
 0x209   : > { %2337 = vmatprep.subr.bf16.mxu1 %v2542_v36 }
 0x20c   : > { %2338 = vmatpush3.bf16.msra.mxu1 %v2542_v36 }
 0x20d   : > { %2339 = vmatprep.subr.bf16.mxu1 %v2543_v37 }
 0x20f   : > { %1402 = vmatmul.mubr.bf16.gmra.mxu1 %v1180_v38 }
 0x210   : > { %2340 = vmatpush3.bf16.msra.mxu1 %v2543_v37  ;;  %1411 = vmatprep.mubr.bf16.mxu1 %v2763_v6 }
 0x211   : > { %2341 = vmatprep.subr.bf16.mxu1 %v2544_v39 }
 0x214   : > { %2342 = vmatpush3.bf16.msra.mxu1 %v2544_v39 }
 0x215   : > { %2343 = vmatprep.subr.bf16.mxu1 %v2545_v40 }
 0x217   : > { %1412 = vmatmul.mubr.bf16.gmra.mxu1 %v1181_v41 }
 0x218   : > { %2344 = vmatpush3.bf16.msra.mxu1 %v2545_v40  ;;  %1421 = vmatprep.mubr.bf16.mxu1 %v2763_v6  ;;  %v2549_v6 = vld [vmem:[%s3338_s3] sm:$0xff]  }
 0x219   : > { %2345 = vmatprep.subr.bf16.mxu1 %v2546_v42  ;;  %2303 = vmatprep.mubr.msk.bf16.mxu0 %vm809_vm1, %v2549_v6 }
 0x21a   : > { %2304 = vmatmul.mubr.msk.bf16.vlgmr.msra.gmra.mxu0 %vm809_vm1, %v2550_v46 }
 0x21b   : > { %2256 = vmatpush3.bf16.msra.mxu0 %v2552_v48  ;;  %2307 = vmatprep.mubr.msk.bf16.mxu0 %vm809_vm1, %v2553_v49 }
 0x21c   : > { %2346 = vmatpush3.bf16.msra.mxu1 %v2546_v42  ;;  %2257 = vmatprep.subr.bf16.mxu0 %v2555_v51 }
 0x21d   : > { %2347 = vmatprep.subr.bf16.mxu1 %v2547_v43 }
 0x21f   : > { %1422 = vmatmul.mubr.bf16.gmra.mxu1 %v1182_v44  ;;  %2258 = vmatpush3.bf16.msra.mxu0 %v2556_v52 }
 0x220   : > { %2348 = vmatpush3.bf16.msra.mxu1 %v2547_v43  ;;  %2351 = vmatprep.mubr.bf16.mxu1 %v1179_v35 }
 0x221   : > { %2349 = vmatprep.subr.bf16.mxu1 %v2548_v45  ;;  %2259 = vmatprep.subr.bf16.mxu0 %v2557_v53 }
 0x222   : > { %2308 = vmatmul.mubr.msk.bf16.gmra.mxu0 %vm809_vm1, %v2554_v50 }
 0x223   : > { %2260 = vmatpush3.bf16.msra.mxu0 %v2558_v54  ;;  %2311 = vmatprep.mubr.msk.bf16.mxu0 %vm809_vm1, %v2559_v55 }
 0x224   : > { %2350 = vmatpush3.bf16.msra.mxu1 %v2548_v45  ;;  %2261 = vmatprep.subr.bf16.mxu0 %v2561_v57 }
 0x227   : > { %2352 = vmatmul.mubr.bf16.vlgmr.msra.gmra.mxu1 %v1180_v38  ;;  %2262 = vmatpush3.bf16.msra.mxu0 %v2562_v58 }
 0x228   : > { %2355 = vmatprep.mubr.bf16.mxu1 %v1181_v41  ;;  %2263 = vmatprep.subr.bf16.mxu0 %v2563_v59 }
 0x22a   : > { %2312 = vmatmul.mubr.msk.bf16.gmra.mxu0 %vm809_vm1, %v2560_v56 }
 0x22b   : > { %2264 = vmatpush3.bf16.msra.mxu0 %v2564_v60  ;;  %2315 = vmatprep.mubr.msk.bf16.mxu0 %vm809_vm1, %v2565_v61 }
 0x22c   : > { %2265 = vmatprep.subr.bf16.mxu0 %v2567_v63 }
 0x22f   : > { %2356 = vmatmul.mubr.bf16.gmra.mxu1 %v1182_v44  ;;  %2266 = vmatpush3.bf16.msra.mxu0 %v2568_v1  ;;  %v1222_v1 = vsub.s32 1, %v1217_v24 }
 0x230   : > { %2267 = vmatprep.subr.bf16.mxu0 %v2569_v2 }
 0x232   : > { %2316 = vmatmul.mubr.msk.bf16.gmra.mxu0 %vm809_vm1, %v2566_v62 }
 0x233   : > { %2268 = vmatpush3.bf16.msra.mxu0 %v2570_v3 }
 0x234   : > { %2269 = vmatprep.subr.bf16.mxu0 %v2571_v4  ;;  %v1226_v4 = vsub.s32 2, %v1217_v24 }
 0x237   : > { %2270 = vmatpush3.bf16.msra.mxu0 %v2572_v5 }
 0x2a7   : > { %v2321_v7 = vpop.f32.mrf.mxu1 }
 0x2a9   : > { %v956_v8 = vpop.f32.mrf.mxu1 }
 0x2ab   : > { %v2322_v9 = vpop.f32.mrf.mxu1 }
 0x2ac   : > { %v2176_v10 = vpack.c.bf16 %v2322_v9, %v2321_v7  ;;  %v1223_v7 = vrot.slane %v2925_v0, %v1222_v1  ;;  %v1227_v9 = vrot.slane %v2925_v0, %v1226_v4 }
 0x2ad   : > { %v959_v11 = vpop.f32.mrf.mxu1 }
 0x2ae   : > { %2216 = vst [vmem:[%s2927_s24 + $0x48] sm:$0xff] %v2176_v10   ;;  %v2171_v12 = vpack.c.bf16 %v959_v11, %v956_v8 }
 0x2af   : > { %v2325_v13 = vpop.f32.mrf.mxu1 }
 0x2b0   : > { %2215 = vst [vmem:[%s2927_s24 + $0x40] sm:$0xff] %v2171_v12  }
 0x2b1   : > { %v972_v14 = vpop.f32.mrf.mxu1 }
 0x2b3   : > { %v2326_v15 = vpop.f32.mrf.mxu1 }
 0x2b4   : > { %v2186_v16 = vpack.c.bf16 %v2326_v15, %v2325_v13 }
 0x2b5   : > { %v975_v17 = vpop.f32.mrf.mxu1 }
 0x2b6   : > { %2218 = vst [vmem:[%s2927_s24 + $0x58] sm:$0xff] %v2186_v16   ;;  %v2181_v18 = vpack.c.bf16 %v975_v17, %v972_v14 }
 0x2b7   : > { %v2329_v19 = vpop.f32.mrf.mxu1 }
 0x2b8   : > { %2217 = vst [vmem:[%s2927_s24 + $0x50] sm:$0xff] %v2181_v18  }
 0x2b9   : > { %v988_v21 = vpop.f32.mrf.mxu1 }
 0x2bb   : > { %v2330_v22 = vpop.f32.mrf.mxu1 }
 0x2bc   : > { %v2196_v23 = vpack.c.bf16 %v2330_v22, %v2329_v19 }
 0x2bd   : > { %v991_v25 = vpop.f32.mrf.mxu1 }
 0x2be   : > { %2220 = vst [vmem:[%s2927_s24 + $0x68] sm:$0xff] %v2196_v23   ;;  %v2191_v26 = vpack.c.bf16 %v991_v25, %v988_v21 }
 0x2bf   : > { %v2333_v27 = vpop.f32.mrf.mxu1 }
 0x2c0   : > { %2219 = vst [vmem:[%s2927_s24 + $0x60] sm:$0xff] %v2191_v26  }
 0x2c1   : > { %v1004_v29 = vpop.f32.mrf.mxu1 }
 0x2c3   : > { %v2334_v30 = vpop.f32.mrf.mxu1 }
 0x2c4   : > { %v2206_v31 = vpack.c.bf16 %v2334_v30, %v2333_v27 }
 0x2c5   : > { %v1007_v33 = vpop.f32.mrf.mxu1 }
 0x2c6   : > { %2222 = vst [vmem:[%s2927_s24 + $0x78] sm:$0xff] %v2206_v31   ;;  %v2201_v34 = vpack.c.bf16 %v1007_v33, %v1004_v29 }
 0x2c7   : > { %v1393_v35 = vpop.f32.mrf.mxu1 }
 0x2c8   : > { %2221 = vst [vmem:[%s2927_s24 + $0x70] sm:$0xff] %v2201_v34   ;;  %v1394_v36 = vadd.f32 %v1393_v35, %v1219_v32 }
 0x2c9   : > { %v1395_v37 = vpop.f32.mrf.mxu1 }
 0x2ca   : > { %v1497_v38 = vmax.f32 %v1394_v36, 0.0  ;;  %v1396_v14 = vadd.f32 %v1395_v37, %v1223_v7 }
 0x2cb   : > { %v1397_v39 = vpop.f32.mrf.mxu1 }
 0x2cc   : > { %1521 = vst [vmem:[#allocation2 + $0x30] sm:$0xff] %v1497_v38  ;;  %v1398_v40 = vadd.f32 %v1397_v39, %v1219_v32  ;;  %v1498_v24 = vmax.f32 %v1396_v14, 0.0 }
 0x2cd   : > { %v1399_v41 = vpop.f32.mrf.mxu1 }
 0x2ce   : > { %v1500_v42 = vmax.f32 %v1398_v40, 0.0  ;;  %v1400_v10 = vadd.f32 %v1399_v41, %v1223_v7 }
 0x2cf   : > { %v1403_v43 = vpop.f32.mrf.mxu1 }
 0x2d0   : > { %1522 = vst [vmem:[#allocation2] sm:$0xff] %v1500_v42  ;;  %v1404_v44 = vadd.f32 %v1403_v43, %v1219_v32  ;;  %v1501_v18 = vmax.f32 %v1400_v10, 0.0 }
 0x2d1   : > { %v1405_v45 = vpop.f32.mrf.mxu1 }
 0x2d2   : > { %v1503_v6 = vmax.f32 %v1404_v44, 0.0  ;;  %v1529_v29 = vpack.c.bf16 %v1501_v18, %v1498_v24  ;;  %v1746_v18 = vand.u32 127, %v1216_v20 }
 0x2d3   : > { %v1407_v46 = vpop.f32.mrf.mxu1 }
 0x2d4   : > { %1523 = vst [vmem:[#allocation2 + $0x18] sm:$0xff] %v1503_v6  ;;  %v1408_v47 = vadd.f32 %v1407_v46, %v1219_v32  ;;  %vm1747_vm2 = vcmp.eq.s32.totalorder %v1746_v18, 7 }
 0x2d5   : > { %v1409_v48 = vpop.f32.mrf.mxu1 }
 0x2d6   : > { %v1506_v49 = vmax.f32 %v1408_v47, 0.0  ;;  %v1410_v0 = vadd.f32 %v1409_v48, %v1223_v7 }
 0x2d7   : > { %v1413_v50 = vpop.f32.mrf.mxu1 }
 0x2d8   : > { %1524 = vst [vmem:[#allocation2 + $0x10] sm:$0xff] %v1506_v49  ;;  %v1414_v51 = vadd.f32 %v1413_v50, %v1219_v32  ;;  %v1507_v36 = vmax.f32 %v1410_v0, 0.0 }
 0x2d9   : > { %v1415_v52 = vpop.f32.mrf.mxu1 }
 0x2da   : > { %v1509_v53 = vmax.f32 %v1414_v51, 0.0  ;;  %v1416_v44 = vadd.f32 %v1415_v52, %v1223_v7  ;;  %v2305_v52 = vpop.f32.mrf.mxu0 }
 0x2db   : > { %v1417_v54 = vpop.f32.mrf.mxu1 }
 0x2dc   : > { %1525 = vst [vmem:[#allocation2 + $0x8] sm:$0xff] %v1509_v53  ;;  %v1418_v55 = vadd.f32 %v1417_v54, %v1219_v32 }
 0x2dd   : > { %v1419_v56 = vpop.f32.mrf.mxu1 }
 0x2de   : > { %v1512_v57 = vmax.f32 %v1418_v55, 0.0  ;;  %v1420_v41 = vadd.f32 %v1419_v56, %v1223_v7  ;;  %v892_v56 = vpop.f32.mrf.mxu0 }
 0x2df   : > { %v1423_v58 = vpop.f32.mrf.mxu1 }
 0x2e0   : > { %1526 = vst [vmem:[#allocation2 + $0x20] sm:$0xff] %v1512_v57  ;;  %v1424_v59 = vadd.f32 %v1423_v58, %v1219_v32  ;;  %v1513_v6 = vmax.f32 %v1420_v41, 0.0  ;;  %v2306_v57 = vpop.f32.mrf.mxu0 }
 0x2e1   : > { %v1425_v60 = vpop.f32.mrf.mxu1  ;;  %v2136_v58 = vpack.c.bf16 %v2306_v57, %v2305_v52 }
 0x2e2   : > { %v1515_v61 = vmax.f32 %v1424_v59, 0.0  ;;  %v1426_v51 = vadd.f32 %v1425_v60, %v1223_v7  ;;  %v895_v59 = vpop.f32.mrf.mxu0 }
 0x2e3   : > { %v1427_v62 = vpop.f32.mrf.mxu1  ;;  %2208 = vst [vmem:[%s2927_s24 + $0x8] sm:$0xff] %v2136_v58  }
 0x2e4   : > { %1527 = vst [vmem:[#allocation2 + $0x28] sm:$0xff] %v1515_v61  ;;  %v1428_v63 = vadd.f32 %v1427_v62, %v1219_v32  ;;  %v1406_v32 = vadd.f32 %v1405_v45, %v1223_v7  ;;  %v1510_v45 = vmax.f32 %v1416_v44, 0.0  ;;  %v1516_v54 = vmax.f32 %v1426_v51, 0.0  ;;  %v2309_v62 = vpop.f32.mrf.mxu0 }
 0x2e5   : > { %v1429_v2 = vpop.f32.mrf.mxu1  ;;  %v2131_v61 = vpack.c.bf16 %v895_v59, %v892_v56 }
 0x2e6   : > { %v1518_v3 = vmax.f32 %v1428_v63, 0.0  ;;  %v1504_v38 = vmax.f32 %v1406_v32, 0.0  ;;  %v1533_v48 = vpack.c.bf16 %v1513_v6, %v1510_v45  ;;  %v1430_v49 = vadd.f32 %v1429_v2, %v1223_v7  ;;  %v908_v60 = vpop.f32.mrf.mxu0 }
 0x2e7   : > { %v2353_v5 = vpop.f32.mrf.mxu1  ;;  %2132 = vst [vmem:[%s2927_s24] sm:$0xff] %v2131_v61  }
 0x2e8   : > { %1528 = vst [vmem:[#allocation2 + $0x38] sm:$0xff] %v1518_v3  ;;  %v1475_v16 = vadd.f32 %v2353_v5, %v1227_v9  ;;  %v1531_v40 = vpack.c.bf16 %v1507_v36, %v1504_v38  ;;  %v1519_v53 = vmax.f32 %v1430_v49, 0.0  ;;  %v2310_v63 = vpop.f32.mrf.mxu0 }
 0x2e9   : > { %v1466_v8 = vpop.f32.mrf.mxu1  ;;  %v2146_v1 = vpack.c.bf16 %v2310_v63, %v2309_v62 }
 0x2ea   : > { %v1467_v12 = vadd.f32 %v1466_v8, %v1227_v9  ;;  %v1505_v26 = vmax.f32 %v1475_v16, 0.0  ;;  %v1535_v55 = vpack.c.bf16 %v1519_v53, %v1516_v54  ;;  %v911_v2 = vpop.f32.mrf.mxu0 }
 0x2eb   : > { %v2354_v11 = vpop.f32.mrf.mxu1  ;;  %2210 = vst [vmem:[%s2927_s24 + $0x18] sm:$0xff] %v2146_v1   ;;  %v2141_v3 = vpack.c.bf16 %v911_v2, %v908_v60 }
 0x2ec   : > { %v1478_v13 = vadd.f32 %v2354_v11, %v1227_v9  ;;  %v1499_v21 = vmax.f32 %v1467_v12, 0.0  ;;  %v2313_v4 = vpop.f32.mrf.mxu0 }
 0x2ed   : > { %v1469_v15 = vpop.f32.mrf.mxu1  ;;  %2209 = vst [vmem:[%s2927_s24 + $0x10] sm:$0xff] %v2141_v3  }
 0x2ee   : > { %v1470_v17 = vadd.f32 %v1469_v15, %v1227_v9  ;;  %v1508_v22 = vmax.f32 %v1478_v13, 0.0  ;;  %v924_v5 = vpop.f32.mrf.mxu0 }
 0x2ef   : > { %v2357_v19 = vpop.f32.mrf.mxu1 }
 0x2f0   : > { %v1502_v23 = vmax.f32 %v1470_v17, 0.0  ;;  %v1532_v31 = vpack.c.bf16 %v1508_v22, %v1505_v26  ;;  %v1491_v42 = vadd.f32 %v2357_v19, %v1227_v9  ;;  %v2314_v7 = vpop.f32.mrf.mxu0 }
 0x2f1   : > { %v1482_v25 = vpop.f32.mrf.mxu1  ;;  %v2156_v8 = vpack.c.bf16 %v2314_v7, %v2313_v4 }
 0x2f2   : > { %v1530_v27 = vpack.c.bf16 %v1502_v23, %v1499_v21  ;;  %v1483_v28 = vadd.f32 %v1482_v25, %v1227_v9  ;;  %v1517_v46 = vmax.f32 %v1491_v42, 0.0  ;;  %v2069_v21 = vld [vmem:[%s3341_s6] ss:$0 sm:$0xff] }
 0x2f3   : > { %v2358_v30 = vpop.f32.mrf.mxu1  ;;  %2212 = vst [vmem:[%s2927_s24 + $0x28] sm:$0xff] %v2156_v8  }
 0x2f4   : > { %1704 = vmatprep.mubr.bf16.mxu0 %v1530_v27  ;;  %v1511_v34 = vmax.f32 %v1483_v28, 0.0  ;;  %v1494_v43 = vadd.f32 %v2358_v30, %v1227_v9 }
 0x2f5   : > { %1705 = vmatmul.mubr.bf16.vlgmr.msra.gmra.mxu0 %v1529_v29  ;;  %v1485_v33 = vpop.f32.mrf.mxu1 }
 0x2f6   : > { %1712 = vmatprep.mubr.bf16.mxu0 %v1532_v31  ;;  %v1486_v35 = vadd.f32 %v1485_v33, %v1227_v9  ;;  %v1520_v47 = vmax.f32 %v1494_v43, 0.0  ;;  %v927_v9 = vpop.f32.mrf.mxu0 }
 0x2f7   : > { %v2151_v10 = vpack.c.bf16 %v927_v9, %v924_v5 }
 0x2f8   : > { %v1514_v37 = vmax.f32 %v1486_v35, 0.0  ;;  %v1536_v50 = vpack.c.bf16 %v1520_v47, %v1517_v46  ;;  %v2317_v11 = vpop.f32.mrf.mxu0 }
 0x2f9   : > { %2211 = vst [vmem:[%s2927_s24 + $0x20] sm:$0xff] %v2151_v10  }
 0x2fa   : > { %v1534_v39 = vpack.c.bf16 %v1514_v37, %v1511_v34  ;;  %v940_v12 = vpop.f32.mrf.mxu0 }
 0x2fc   : > { %v2318_v13 = vpop.f32.mrf.mxu0 }
 0x2fd   : > { %1713 = vmatmul.mubr.bf16.gmra.mxu0 %v1531_v40  ;;  %v2166_v14 = vpack.c.bf16 %v2318_v13, %v2317_v11 }
 0x2fe   : > { %1720 = vmatprep.mubr.bf16.mxu0 %v1534_v39  ;;  %v943_v15 = vpop.f32.mrf.mxu0 }
 0x2ff   : > { %2214 = vst [vmem:[%s2927_s24 + $0x38] sm:$0xff] %v2166_v14   ;;  %v2161_v16 = vpack.c.bf16 %v943_v15, %v940_v12 }
 0x301   : > { %2213 = vst [vmem:[%s2927_s24 + $0x30] sm:$0xff] %v2161_v16   ;;  %s2637_s24 = scalar_lea.vmem %s2636_s17, 4096 }
 0x302   : > { %p2639_p4 = scmp.lt.s32.totalorder %s2637_s24, %s2631_s14 }
 0x304   : > { %p2640_p5 = por %p2639_p4, %p2638_p2 }
 0x305   : > { %1721 = vmatmul.mubr.bf16.gmra.mxu0 %v1533_v48 }
 0x306   : > { %1728 = vmatprep.mubr.bf16.mxu0 %v1536_v50  ;;  %p2641_p6 = pnand %p2640_p5, %p2634_p1 }
 0x30d   : > { %1729 = vmatmul.mubr.bf16.gmra.mxu0 %v1535_v55 }
 0x3b5   : > { %v2271_v17 = vpop.f32.mrf.mxu0 }
 0x3b7   : > { %v2272_v19 = vpop.f32.mrf.mxu0 }
 0x3b8   : > { %v2273_v22 = vadd.f32 %v2272_v19, %v2271_v17 }
 0x3b9   : > { %v2274_v23 = vpop.f32.mrf.mxu0 }
 0x3ba   : > { %v1707_v24 = vadd.f32 %v2273_v22, %v2069_v21 }
 0x3bb   : > { %v2275_v25 = vpop.f32.mrf.mxu0 }
 0x3bc   : > { %v2276_v26 = vadd.f32 %v2275_v25, %v2274_v23  ;;  %v1748_v27 = vsel %vm1747_vm2, %v1707_v24, 0.0  ;;  %1737 = vst [vmem:[%s2929_s5] sm:$0xff] %v1707_v24 }
 0x3bd   : > { %v2277_v28 = vpop.f32.mrf.mxu0  ;;  %1756 = vadd.xlane.f32.xlu0 %v1748_v27 }
 0x3be   : > { %v1710_v29 = vadd.f32 %v2276_v26, %v2069_v21 }
 0x3bf   : > { %v2278_v20 = vpop.f32.mrf.mxu0 }
 0x3c0   : > { %v2279_v0 = vadd.f32 %v2278_v20, %v2277_v28  ;;  %v1749_v30 = vsel %vm1747_vm2, %v1710_v29, 0.0  ;;  %1738 = vst [vmem:[%s2929_s5 + $0x8] sm:$0xff] %v1710_v29 }
 0x3c1   : > { %v2280_v31 = vpop.f32.mrf.mxu0  ;;  %1758 = vadd.xlane.f32.xlu1 %v1749_v30 }
 0x3c2   : > { %v1715_v32 = vadd.f32 %v2279_v0, %v2069_v21 }
 0x3c3   : > { %v2281_v33 = vpop.f32.mrf.mxu0 }
 0x3c4   : > { %v2282_v34 = vadd.f32 %v2281_v33, %v2280_v31  ;;  %1739 = vst [vmem:[%s2929_s5 + $0x10] sm:$0xff] %v1715_v32  ;;  %v1750_v35 = vsel %vm1747_vm2, %v1715_v32, 0.0 }
 0x3c5   : > { %v2283_v36 = vpop.f32.mrf.mxu0  ;;  %1760 = vadd.xlane.f32.xlu0 %v1750_v35 }
 0x3c6   : > { %v1718_v37 = vadd.f32 %v2282_v34, %v2069_v21 }
 0x3c7   : > { %v2284_v38 = vpop.f32.mrf.mxu0 }
 0x3c8   : > { %v2285_v39 = vadd.f32 %v2284_v38, %v2283_v36  ;;  %1740 = vst [vmem:[%s2929_s5 + $0x18] sm:$0xff] %v1718_v37  ;;  %v1751_v40 = vsel %vm1747_vm2, %v1718_v37, 0.0 }
 0x3c9   : > { %v2286_v41 = vpop.f32.mrf.mxu0  ;;  %1762 = vadd.xlane.f32.xlu0 %v1751_v40 }
 0x3ca   : > { %v1723_v42 = vadd.f32 %v2285_v39, %v2069_v21 }
 0x3cb   : > { %v2287_v43 = vpop.f32.mrf.mxu0 }
 0x3cc   : > { %v2288_v44 = vadd.f32 %v2287_v43, %v2286_v41  ;;  %1741 = vst [vmem:[%s2929_s5 + $0x20] sm:$0xff] %v1723_v42  ;;  %v1752_v6 = vsel %vm1747_vm2, %v1723_v42, 0.0 }
 0x3cd   : > { %v2289_v46 = vpop.f32.mrf.mxu0  ;;  %1764 = vadd.xlane.f32.xlu1 %v1752_v6 }
 0x3ce   : > { %v1726_v47 = vadd.f32 %v2288_v44, %v2069_v21 }
 0x3cf   : > { %v2290_v45 = vpop.f32.mrf.mxu0 }
 0x3d0   : > { %v2291_v48 = vadd.f32 %v2290_v45, %v2289_v46  ;;  %1742 = vst [vmem:[%s2929_s5 + $0x28] sm:$0xff] %v1726_v47  ;;  %v1753_v49 = vsel %vm1747_vm2, %v1726_v47, 0.0 }
 0x3d1   : > { %v2292_v50 = vpop.f32.mrf.mxu0  ;;  %1766 = vadd.xlane.f32.xlu0 %v1753_v49 }
 0x3d2   : > { %v1731_v51 = vadd.f32 %v2291_v48, %v2069_v21 }
 0x3d3   : > { %v2293_v53 = vpop.f32.mrf.mxu0 }
 0x3d4   : > { %v2294_v54 = vadd.f32 %v2293_v53, %v2292_v50  ;;  %1743 = vst [vmem:[%s2929_s5 + $0x30] sm:$0xff] %v1731_v51  ;;  %v1754_v55 = vsel %vm1747_vm2, %v1731_v51, 0.0 }
 0x3d5   : > { %1768 = vadd.xlane.f32.xlu1 %v1754_v55 }
 0x3d6   : > { %v1734_v52 = vadd.f32 %v2294_v54, %v2069_v21 }
 0x3d8   : > { %1744 = vst [vmem:[%s2929_s5 + $0x38] sm:$0xff] %v1734_v52  ;;  %v1755_v56 = vsel %vm1747_vm2, %v1734_v52, 0.0 }
 0x3d9   : > { %1770 = vadd.xlane.f32.xlu0 %v1755_v56 }
 0x3da   : > { %2644 = shalt.err (!%p2641_p6)
}
 0x3db   : > { %s2645_s15 = scalar_lea.hbm %s3238_s26, 2048  ;;  %s2649_s21 = scalar_lea.hbm %s3342_s7, 8192 }
 0x3dc   : > { %p2646_p7 = scmp.ne.s32.totalorder %s3238_s26, %s2645_s15  ;;  %p2650_p13 = scmp.lt.s32.totalorder %s3238_s26, %s3342_s7 }
 0x3dd   : > { %p2651_p10 = scmp.lt.s32.totalorder %s2649_s21, %s2645_s15 }
 0x3de   : > { %p2647_p9 = pnand %p2646_p7, %p2867_p3 }
 0x3df   : > { %p2652_p12 = por %p2651_p10, %p2650_p13 }
 0x3e0   : > { %p2648_p11 = pneg %p2647_p9 }
 0x3e2   : > { %p2653_p0 = pnand %p2652_p12, %p2648_p11 }
 0x3e4   : > { %2656 = shalt.err (!%p2653_p0)
}
 0x3e5   : > { %s2765_s14 = smov 64   ;;  %s2766_s17 = smov 4  }
 0x3e6   : > { %2388 = dma.vmem_to_hbm [thread:$0]  (%p2867_p3), %s3240_s16, 2048, %s3238_s26, %s1782_s18, %s2765_s14, %s2765_s14, %s2766_s17  }
 0x3e7   : > { %s2092_s10 = sshll.u32 %s2745_s9, 4  ;;  %s1820_s24 = sshll.u32 %s2929_s5, 4  ;;  %s3269_s24 = int_to_ptr.vmem [resolvable:$true] %s1820_s24 }
 0x3e8   : > { %s3365_s15 = sshll.u32 %s2741_s30, 3  ;;  %s1787_s1 = scalar_lea.sflag [#allocation9], %s2917_s13 }
 0x3e9   : > { %s1817_s11 = sadd.s32 %s2092_s10, %s3365_s15  ;;  %s2657_s2 = scalar_lea.vmem %s3269_s24, 1024 }
 0x3ea   : > { %s2093_s23 = sshll.u32 %s1817_s11, 7  ;;  %p2658_p1 = scmp.ne.s32.totalorder %s3269_s24, %s2657_s2 }
 0x3eb   : > { %s3274_s0 = scalar_lea.hbm %s3343_s8, %s2093_s23  ;;  %s2767_s5 = smov [#allocation8]  }
 0x3ec   : > { %p2659_p2 = pnand %p2658_p1, %p2867_p3  ;;  %s2661_s30 = sshll.u32 %s2767_s5, 4  ;;  %s2662_s30 = int_to_ptr.vmem [resolvable:$false] %s2661_s30 }
 0x3ed   : > { %s2663_s9 = scalar_lea.vmem %s2662_s30, 2048  ;;  %p2664_p5 = scmp.lt.s32.totalorder %s3269_s24, %s2662_s30 }
 0x3ee   : > { %p2660_p4 = pneg %p2659_p2  ;;  %p2665_p6 = scmp.lt.s32.totalorder %s2663_s9, %s2657_s2 }
 0x3f0   : > { %p2666_p7 = por %p2665_p6, %p2664_p5 }
 0x3f2   : > { %p2667_p9 = pnand %p2666_p7, %p2660_p4 }
 0x3f4   : > { %2670 = shalt.err (!%p2667_p9)
}
 0x3f5   : > { %s2671_s16 = scalar_lea.hbm %s3274_s0, 1024  ;;  %s2675_s14 = scalar_lea.hbm %s3343_s8, 4096 }
 0x3f6   : > { %p2672_p11 = scmp.ne.s32.totalorder %s3274_s0, %s2671_s16  ;;  %p2676_p12 = scmp.lt.s32.totalorder %s3274_s0, %s3343_s8 }
 0x3f7   : > { %p2677_p0 = scmp.lt.s32.totalorder %s2675_s14, %s2671_s16 }
 0x3f8   : > { %p2673_p13 = pnand %p2672_p11, %p2867_p3 }
 0x3f9   : > { %p2678_p1 = por %p2677_p0, %p2676_p12 }
 0x3fa   : > { %p2674_p10 = pneg %p2673_p13 }
 0x3fc   : > { %p2679_p2 = pnand %p2678_p1, %p2674_p10 }
 0x3fe   : > { %2682 = shalt.err (!%p2679_p2)
}
 0x3ff   : > { %s2768_s2 = smov 128   ;;  %s2769_s15 = smov 8   ;;  %vm1772_vm3 = vcmask 7168  }
 0x400   : > { %2389 = dma.vmem_to_hbm [thread:$0]  (%p2867_p3), %s3269_s24, 1024, %s3274_s0, %s1787_s1, %s2768_s2, %s2768_s2, %s2769_s15  }
 0x446   : > { %v1757_v57 = vpop.xlane.xlu0 %1756 }
 0x447   : > { %1773 = vst.msk [vmem:[#allocation3] sm:$0xff] %vm1772_vm3, %v1757_v57 }
 0x44a   : > { %v1759_v58 = vpop.xlane.xlu1 %1758 }
 0x44b   : > { %1774 = vst.msk [vmem:[#allocation3 + $0x8] sm:$0xff] %vm1772_vm3, %v1759_v58 }
 0x44e   : > { %v1761_v59 = vpop.xlane.xlu0 %1760 }
 0x44f   : > { %1775 = vst.msk [vmem:[#allocation3 + $0x10] sm:$0xff] %vm1772_vm3, %v1761_v59 }
 0x452   : > { %v1763_v61 = vpop.xlane.xlu0 %1762 }
 0x453   : > { %1776 = vst.msk [vmem:[#allocation3 + $0x18] sm:$0xff] %vm1772_vm3, %v1763_v61 }
 0x456   : > { %v1765_v62 = vpop.xlane.xlu1 %1764 }
 0x457   : > { %1777 = vst.msk [vmem:[#allocation3 + $0x20] sm:$0xff] %vm1772_vm3, %v1765_v62 }
 0x45a   : > { %v1767_v60 = vpop.xlane.xlu0 %1766 }
 0x45b   : > { %1778 = vst.msk [vmem:[#allocation3 + $0x28] sm:$0xff] %vm1772_vm3, %v1767_v60 }
 0x45e   : > { %v1769_v63 = vpop.xlane.xlu1 %1768 }
 0x45f   : > { %1779 = vst.msk [vmem:[#allocation3 + $0x30] sm:$0xff] %vm1772_vm3, %v1769_v63 }
 0x462   : > { %v1771_v1 = vpop.xlane.xlu0 %1770 }
 0x463   : > { %1780 = vst.msk [vmem:[#allocation3 + $0x38] sm:$0xff] %vm1772_vm3, %v1771_v1 }
 0x464 PF: > { %p2405_p3 = scmp.ge.s32.totalorder %s2757_s12, 2  ;;  %s1835_s0 = sand.u32 1, %s2729_s27  }
 0x465   : > { %s1836_s1 = scalar_lea.sflag [#allocation6], %s1835_s0 }
 0x466   : > { %p2397_p4 = pnand %p2405_p3, %p2876_p8 }
 0x468   : > { %p2398_p5 = pneg %p2397_p4 }
 0x46a   : > { %2720 = dma.done.wait (%p2398_p5), %s1836_s1, 2048  }
 0x46b   : > { %2722 = vsyncadd (%p2398_p5), %s1836_s1, 4294965248  ;;  %s1845_s19 = scalar_lea.sflag [#allocation9], %s1835_s0 }
 0x46c   : > { %2724 = dma.done.wait (%p2398_p5), %s1845_s19, 1024  }
 0x46d   : > { %2726 = vsyncadd (%p2398_p5), %s1845_s19, 4294966272  ;;  %s26_s12 = sadd.s32 1, %s2757_s12   ;;  %s3366_s30 = sld [smem:[#allocation13_spill]] }
 0x46e   : > { %p23_p6 = scmp.ge.s32.totalorder %s26_s12, 6   ;;  %s3367_s9 = sld [smem:[#allocation14_spill]] }
 0x46f   : > { %s3368_s10 = sld [smem:[#allocation15_spill]]  ;;  %s3370_s27 = smov %s2733_s28 }
 0x470   : > { %s3369_s11 = sld [smem:[#allocation16_spill]]  ;;  %s3371_s28 = smov %s2737_s29 }
 0x471   : > { %s3372_s29 = smov %s2894_s25  ;;  %25 = sbr.rel (!%p23_p6) target bundleno = 13 (0xd), region = 109 }
 0x476   :  { %1850 = vsyncpa [#allocation5], 1 }
 0x477   :  { %1852 = vsyncpa [#allocation5 + $0x1], 1 }
 0x478   :  { %1853 = vsyncpa [#allocation6], 1 }
 0x479   :  { %1855 = vsyncpa [#allocation6 + $0x1], 1 }
 0x47a   :  { %1856 = vsyncpa [#allocation9], 1 }
 0x47b   :  { %1858 = vsyncpa [#allocation9 + $0x1], 1 }

</bundles_post_ra>
